<compile_context>
chip_gen: v5e
topology: v5e:2x2
jax: 0.10.0
libtpu: 0.0.40
codegen_flags: <defaults>
</compile_context>

<pallas_src>
import functools

import jax
import jax.numpy as jnp
from jax.experimental import pallas as pl
from jax.experimental.pallas import tpu as pltpu


# ----------------------------------------------------------------------------
# Fused kernel over a block of TB samples.
#   x_ref    : (TB, C, HW)       VMEM
#   w1_ref   : (C, hidden)       VMEM   (1x1 conv as (in, out) matrix)
#   b1_ref   : (1, hidden)       VMEM
#   w2_ref   : (hidden, 2k*C)    VMEM   (columns reordered j-major: col = j*C+c)
#   b2_ref   : (1, 2k*C)         VMEM   (same column order)
#   ws_ref   : (C, 1)            VMEM   (spatial 1x1 conv weight)
#   bs_ref   : (1,)              SMEM   spatial conv bias
#   lam_ref  : (2k,)             SMEM   lambdas buffer
#   bias_ref : (2k,)             SMEM   bias buffer
#   o_ref    : (TB, C, HW)       VMEM
# ----------------------------------------------------------------------------
def _dyrelu_c_kernel(k, C, gsize, gpad, inv_tau, gamma_hw,
                     x_ref, w1_ref, b1_ref, w2_ref, b2_ref, ws_ref,
                     bs_ref, lam_ref, bias_ref, o_ref):
    f32 = jnp.float32
    x = x_ref[...].astype(f32)                              # (TB, C, HW)
    HW = x.shape[2]

    # ---- channel coefficients: GAP -> 1x1 MLP -> sigmoid -> affine ----------
    pooled = jnp.mean(x, axis=2)                            # (TB, C)
    h = jnp.dot(pooled, w1_ref[...], preferred_element_type=f32) + b1_ref[...]
    h = jnp.maximum(h, 0.0)                                 # (TB, hidden)
    z = jnp.dot(h, w2_ref[...], preferred_element_type=f32) + b2_ref[...]
    # 2*sigmoid(z) - 1 == tanh(z/2): exact, no inf intermediate, single EUP op.
    coef = jnp.tanh(0.5 * z)                                # (TB, 2k*C), j-major

    def ab(j):
        # per-(sample, channel) coefficient for slot j, shaped for lane bcast
        cj = coef[:, j * C:(j + 1) * C] * lam_ref[j] + bias_ref[j]   # (TB, C)
        return cj[:, :, None]                               # (TB, C, 1)

    # max_j (a_j * x + b_j)
    out = x * ab(0) + ab(k)
    for j in range(1, k):
        out = jnp.maximum(out, x * ab(j) + ab(k + j))

    # ---- spatial gate: 1x1 conv -> grouped softmax -> *gamma -> clamp -------
    s = (jnp.sum(x * ws_ref[...], axis=1) + bs_ref[0]) * inv_tau      # (TB, HW)

    # Group-membership one-hots generated in-kernel (cheap VPU iota compares;
    # no HBM traffic, no double-buffered VMEM).  Group of lane p is p // gsize.
    pos = jax.lax.broadcasted_iota(jnp.int32, (HW, gpad), 0)
    grp = jax.lax.broadcasted_iota(jnp.int32, (HW, gpad), 1)
    eg = jnp.where((pos >= grp * gsize) & (pos < (grp + 1) * gsize), 1.0, 0.0)
    posT = jax.lax.broadcasted_iota(jnp.int32, (gpad, HW), 1)
    grpT = jax.lax.broadcasted_iota(jnp.int32, (gpad, HW), 0)
    egt = jnp.where((posT >= grpT * gsize) & (posT < (grpT + 1) * gsize), 1.0, 0.0)

    # Grouped softmax, batched over the TB samples.  Shift by the per-group
    # mean (softmax is invariant to any per-group shift); since max >= mean,
    # the per-group denominator is >= 1 and cannot underflow to 0.
    gmean = jnp.dot(jnp.dot(s, eg, preferred_element_type=f32) * (1.0 / gsize),
                    egt, preferred_element_type=f32)                  # (TB, HW)
    e = jnp.exp(s - gmean)                                            # (TB, HW)
    gden = jnp.dot(jnp.dot(e, eg, preferred_element_type=f32),
                   egt, preferred_element_type=f32)                   # (TB, HW)
    gden = jnp.maximum(gden, 1e-30)                                   # safety floor
    gate = jnp.clip(gamma_hw * e * pl.reciprocal(gden, approx=False), 0.0, 1.0)

    # gate >= 0, so gate * max_j(...) == max_j(gate * ...), matching PyTorch.
    o_ref[...] = (out * gate[:, None, :]).astype(o_ref.dtype)


def dyrelu_c(x, w1, b1, w2, b2, ws, bs, lambdas, bias_buf,
             *, k=2, tau=10.0, gamma=1.0 / 3.0):
    """x: (N, C, H, W). Returns (N, C, H, W). Forward of DyReLUC."""
    N, C, H, W = x.shape
    HW = H * W
    hidden = w1.shape[1]
    two_k = 2 * k
    assert w2.shape == (hidden, two_k * C)
    assert HW % C == 0, "module's spatial view(N, C, HW//C) requires C | H*W"
    gsize = HW // C
    gpad = ((C + 127) // 128) * 128          # group axis padded to a lane multiple

    x3 = x.reshape(N, C, HW)

    f32 = jnp.float32
    w1f = w1.astype(f32)
    b1r = b1.reshape(1, hidden).astype(f32)
    # Reorder the 2nd conv so z columns are j-major (col = j*C + c): each slot j
    # is then a contiguous (TB, C) slice in the kernel (no in-kernel gather).
    w2r = jnp.transpose(w2.reshape(hidden, C, two_k), (0, 2, 1)) \
             .reshape(hidden, two_k * C).astype(f32)
    b2r = jnp.transpose(b2.reshape(C, two_k), (1, 0)).reshape(1, two_k * C).astype(f32)
    ws_col = ws.reshape(C, 1).astype(f32)
    bs_arr = jnp.reshape(bs, (1,)).astype(f32)
    lam = lambdas.astype(f32).reshape(two_k)
    bia = bias_buf.astype(f32).reshape(two_k)

    # ---- samples per grid step (TB): amortize per-step pipeline overhead by
    # moving ~1 MiB of x per step, keep the grid length >= 2 so both v7x
    # TensorCores get work, and pick a divisor of N (no padded edge block).
    bytes_per_sample = C * HW * x.dtype.itemsize
    tb = max(1, min(N, (1 << 20) // max(1, bytes_per_sample)))
    tb = min(tb, max(1, N // 2))
    while N % tb:
        tb -= 1
    grid_n = N // tb

    # Double-buffered in+out tiles plus temporaries; clamp to [32, 48] MiB so it
    # is safe on v7x (64 MiB physical) and above the scoped default elsewhere.
    tile_bytes = tb * C * HW * x.dtype.itemsize
    vmem_limit = int(min(48 * 2**20, max(32 * 2**20, 10 * tile_bytes + (8 << 20))))

    kernel = functools.partial(_dyrelu_c_kernel, k, C, gsize, gpad,
                               1.0 / tau, gamma * H * W)

    cost = pl.CostEstimate(
        flops=int(N * (4 * k * C * HW + 4 * C * HW + 8 * HW * gpad)),
        transcendentals=int(N * (HW + two_k * C)),
        bytes_accessed=int(2 * N * C * HW * x.dtype.itemsize),
    )

    out3 = pl.pallas_call(
        kernel,
        out_shape=jax.ShapeDtypeStruct((N, C, HW), x.dtype),
        grid=(grid_n,),
        in_specs=[
            pl.BlockSpec((tb, C, HW), lambda n: (n, 0, 0)),        # x tile
            pl.BlockSpec((C, hidden), lambda n: (0, 0)),           # w1
            pl.BlockSpec((1, hidden), lambda n: (0, 0)),           # b1
            pl.BlockSpec((hidden, two_k * C), lambda n: (0, 0)),   # w2 (j-major)
            pl.BlockSpec((1, two_k * C), lambda n: (0, 0)),        # b2 (j-major)
            pl.BlockSpec((C, 1), lambda n: (0, 0)),                # spatial conv w
            pl.BlockSpec(memory_space=pltpu.MemorySpace.SMEM),     # bs (1,)
            pl.BlockSpec(memory_space=pltpu.MemorySpace.SMEM),     # lambdas (2k,)
            pl.BlockSpec(memory_space=pltpu.MemorySpace.SMEM),     # bias (2k,)
        ],
        out_specs=pl.BlockSpec((tb, C, HW), lambda n: (n, 0, 0)),
        compiler_params=pltpu.CompilerParams(
            dimension_semantics=("parallel",),
            vmem_limit_bytes=vmem_limit),
        cost_estimate=cost,
    )(x3, w1f, b1r, w2r, b2r, ws_col, bs_arr, lam, bia)

    return out3.reshape(N, C, H, W)


# ----------------------------------------------------------------------------
# Pure-JAX reference (mirrors the PyTorch DyReLUC forward exactly)
# ----------------------------------------------------------------------------
def dyrelu_c_ref(x, w1, b1, w2, b2, ws, bs, lambdas, bias_buf,
                 *, k=2, tau=10.0, gamma=1.0 / 3.0):
    N, C, H, W = x.shape
    HW = H * W
    pooled = x.mean(axis=(2, 3))                                   # (N, C)
    h = jax.nn.relu(pooled @ w1 + b1)                              # (N, hidden)
    sig = jax.nn.sigmoid(h @ w2 + b2)                              # (N, 2kC)
    coef = (2.0 * sig - 1.0).reshape(N, C, 2 * k) * lambdas + bias_buf
    a = coef[:, :, :k]
    b = coef[:, :, k:]
    spatial = jnp.einsum('nchw,c->nhw', x, ws) + bs                # (N, H, W)
    s = spatial.reshape(N, C, HW // C) / tau                       # module's grouped view
    s = jax.nn.softmax(s, axis=-1) * (gamma * H * W)
    gate = jnp.clip(s, 0.0, 1.0).reshape(N, 1, H, W)
    out = x[:, :, :, :, None] * a[:, :, None, None, :] + b[:, :, None, None, :]
    out = gate[..., None] * out
    return out.max(axis=-1)


if __name__ == "__main__":
    C, H, W = 4, 16, 16
    reduction, k = 4, 2
    tau, gamma = 10.0, 1.0 / 3.0
    hidden = C // reduction
    two_k = 2 * k

    key = jax.random.PRNGKey(0)
    kx, k1, k2, k3, k4, k5, k6, kx2 = jax.random.split(key, 8)

    # 1x1 convs stored as (in, out) matrices / flat vectors.
    w1 = jax.random.normal(k1, (C, hidden), jnp.float32) * 0.5
    b1 = jax.random.normal(k2, (hidden,), jnp.float32) * 0.1
    w2 = jax.random.normal(k3, (hidden, two_k * C), jnp.float32) * 0.5
    b2 = jax.random.normal(k4, (two_k * C,), jnp.float32) * 0.1
    ws = jax.random.normal(k5, (C,), jnp.float32) * 0.5            # spatial conv weight
    bs = jax.random.normal(k6, (), jnp.float32) * 0.1              # spatial conv bias

    # Registered buffers from the module.
    lambdas = jnp.array([1.0] * k + [0.5] * k, jnp.float32)
    bias_buf = jnp.array([1.0] + [0.0] * (two_k - 1), jnp.float32)

    # Case 1: the canonical small shape (N=2 -> TB=1, grid=2).
    x = jax.random.normal(kx, (2, C, H, W), jnp.float32)
    out = jax.block_until_ready(
        dyrelu_c(x, w1, b1, w2, b2, ws, bs, lambdas, bias_buf,
                 k=k, tau=tau, gamma=gamma))
    ref = dyrelu_c_ref(x, w1, b1, w2, b2, ws, bs, lambdas, bias_buf,
                       k=k, tau=tau, gamma=gamma)
    assert out.shape == (2, C, H, W)
    assert jnp.allclose(out, ref, atol=1e-4, rtol=1e-4), "mismatch vs reference (N=2)"

    # Case 2: exercises the multi-sample block path (N=8 -> TB=4, grid=2).
    x2 = jax.random.normal(kx2, (8, C, H, W), jnp.float32)
    out2 = jax.block_until_ready(
        dyrelu_c(x2, w1, b1, w2, b2, ws, bs, lambdas, bias_buf,
                 k=k, tau=tau, gamma=gamma))
    ref2 = dyrelu_c_ref(x2, w1, b1, w2, b2, ws, bs, lambdas, bias_buf,
                        k=k, tau=tau, gamma=gamma)
    assert out2.shape == (8, C, H, W)
    assert jnp.allclose(out2, ref2, atol=1e-4, rtol=1e-4), "mismatch vs reference (N=8)"

    print("KERNEL_OK")
</pallas_src>

<mosaic_0001>
module attributes {stable_mosaic.version = 11 : i64} {
  func.func @_dyrelu_c_kernel(%arg0: i32, %arg1: memref<1x4x256xf32, #tpu.memory_space<vmem>>, %arg2: memref<4x1xf32, #tpu.memory_space<vmem>>, %arg3: memref<1x1xf32, #tpu.memory_space<vmem>>, %arg4: memref<1x16xf32, #tpu.memory_space<vmem>>, %arg5: memref<1x16xf32, #tpu.memory_space<vmem>>, %arg6: memref<4x1xf32, #tpu.memory_space<vmem>>, %arg7: memref<1xf32, #tpu.memory_space<smem>>, %arg8: memref<4xf32, #tpu.memory_space<smem>>, %arg9: memref<4xf32, #tpu.memory_space<smem>>, %arg10: memref<1x4x256xf32, #tpu.memory_space<vmem>>) attributes {dimension_semantics = [#tpu.dimension_semantics<parallel>], iteration_bounds = array<i64: 2>, scalar_prefetch = 0 : i64, scratch_operands = 0 : i64, tpu.core_type = #tpu.core_type<tc>, window_params = [{transform_indices = @transform_0, window_bounds = array<i64: 1, 4, 256>}, {pipeline_mode = #tpu.pipeline_mode<synchronous>, transform_indices = @transform_1, window_bounds = array<i64: 4, 1>}, {pipeline_mode = #tpu.pipeline_mode<synchronous>, transform_indices = @transform_2, window_bounds = array<i64: 1, 1>}, {pipeline_mode = #tpu.pipeline_mode<synchronous>, transform_indices = @transform_3, window_bounds = array<i64: 1, 16>}, {pipeline_mode = #tpu.pipeline_mode<synchronous>, transform_indices = @transform_4, window_bounds = array<i64: 1, 16>}, {pipeline_mode = #tpu.pipeline_mode<synchronous>, transform_indices = @transform_5, window_bounds = array<i64: 4, 1>}, {transform_indices = @transform_6, window_bounds = array<i64: 1>}, {transform_indices = @transform_7, window_bounds = array<i64: 4>}, {transform_indices = @transform_8, window_bounds = array<i64: 4>}, {transform_indices = @transform_9, window_bounds = array<i64: 1, 4, 256>}]} {
    %c0 = arith.constant 0 : index
    %c0_0 = arith.constant 0 : index
    %c0_1 = arith.constant 0 : index
    %0 = vector.load %arg1[%c0, %c0_0, %c0_1] : memref<1x4x256xf32, #tpu.memory_space<vmem>>, vector<1x4x256xf32>
    %cst = arith.constant dense<0.000000e+00> : vector<1x4xf32>
    %1 = vector.multi_reduction <add>, %0, %cst [2] : vector<1x4x256xf32> to vector<1x4xf32>
    %cst_2 = arith.constant 2.560000e+02 : f32
    %2 = vector.broadcast %cst_2 : f32 to vector<1x4xf32>
    %3 = arith.divf %1, %2 : vector<1x4xf32>
    %c0_3 = arith.constant 0 : index
    %c0_4 = arith.constant 0 : index
    %4 = vector.load %arg2[%c0_3, %c0_4] : memref<4x1xf32, #tpu.memory_space<vmem>>, vector<4x1xf32>
    %cst_5 = arith.constant dense<0.000000e+00> : vector<1x1xf32>
    %5 = tpu.matmul %3, %4, %cst_5 {dimension_numbers = #tpu.dot_dimension_numbers<[1], [0], [0], [1], [0, 0, 1, 1], [], []>} : vector<1x4xf32>, vector<4x1xf32>, vector<1x1xf32> -> vector<1x1xf32>
    %c0_6 = arith.constant 0 : index
    %c0_7 = arith.constant 0 : index
    %6 = vector.load %arg3[%c0_6, %c0_7] : memref<1x1xf32, #tpu.memory_space<vmem>>, vector<1x1xf32>
    %7 = arith.addf %5, %6 : vector<1x1xf32>
    %cst_8 = arith.constant 0.000000e+00 : f32
    %8 = vector.broadcast %cst_8 : f32 to vector<1x1xf32>
    %9 = arith.maximumf %7, %8 : vector<1x1xf32>
    %c0_9 = arith.constant 0 : index
    %c0_10 = arith.constant 0 : index
    %10 = vector.load %arg4[%c0_9, %c0_10] : memref<1x16xf32, #tpu.memory_space<vmem>>, vector<1x16xf32>
    %cst_11 = arith.constant dense<0.000000e+00> : vector<1x16xf32>
    %11 = tpu.matmul %9, %10, %cst_11 {dimension_numbers = #tpu.dot_dimension_numbers<[1], [0], [0], [1], [0, 0, 1, 1], [], []>} : vector<1x1xf32>, vector<1x16xf32>, vector<1x16xf32> -> vector<1x16xf32>
    %c0_12 = arith.constant 0 : index
    %c0_13 = arith.constant 0 : index
    %12 = vector.load %arg5[%c0_12, %c0_13] : memref<1x16xf32, #tpu.memory_space<vmem>>, vector<1x16xf32>
    %13 = arith.addf %11, %12 : vector<1x16xf32>
    %cst_14 = arith.constant 5.000000e-01 : f32
    %14 = vector.broadcast %cst_14 : f32 to vector<1x16xf32>
    %15 = arith.mulf %14, %13 : vector<1x16xf32>
    %16 = math.tanh %15 : vector<1x16xf32>
    %17 = vector.extract_strided_slice %16 {offsets = [0, 0], sizes = [1, 4], strides = [1, 1]} : vector<1x16xf32> to vector<1x4xf32>
    %c0_15 = arith.constant 0 : index
    %18 = memref.load %arg8[%c0_15] : memref<4xf32, #tpu.memory_space<smem>>
    %19 = vector.broadcast %18 : f32 to vector<1x4xf32>
    %20 = arith.mulf %17, %19 : vector<1x4xf32>
    %c0_16 = arith.constant 0 : index
    %21 = memref.load %arg9[%c0_16] : memref<4xf32, #tpu.memory_space<smem>>
    %22 = vector.broadcast %21 : f32 to vector<1x4xf32>
    %23 = arith.addf %20, %22 : vector<1x4xf32>
    %24 = vector.shape_cast %23 : vector<1x4xf32> to vector<1x4x1xf32>
    %25 = vector.broadcast %24 : vector<1x4x1xf32> to vector<1x4x256xf32>
    %26 = arith.mulf %0, %25 : vector<1x4x256xf32>
    %27 = vector.extract_strided_slice %16 {offsets = [0, 8], sizes = [1, 4], strides = [1, 1]} : vector<1x16xf32> to vector<1x4xf32>
    %c2 = arith.constant 2 : index
    %28 = memref.load %arg8[%c2] : memref<4xf32, #tpu.memory_space<smem>>
    %29 = vector.broadcast %28 : f32 to vector<1x4xf32>
    %30 = arith.mulf %27, %29 : vector<1x4xf32>
    %c2_17 = arith.constant 2 : index
    %31 = memref.load %arg9[%c2_17] : memref<4xf32, #tpu.memory_space<smem>>
    %32 = vector.broadcast %31 : f32 to vector<1x4xf32>
    %33 = arith.addf %30, %32 : vector<1x4xf32>
    %34 = vector.shape_cast %33 : vector<1x4xf32> to vector<1x4x1xf32>
    %35 = vector.broadcast %34 : vector<1x4x1xf32> to vector<1x4x256xf32>
    %36 = arith.addf %26, %35 : vector<1x4x256xf32>
    %37 = vector.extract_strided_slice %16 {offsets = [0, 4], sizes = [1, 4], strides = [1, 1]} : vector<1x16xf32> to vector<1x4xf32>
    %c1 = arith.constant 1 : index
    %38 = memref.load %arg8[%c1] : memref<4xf32, #tpu.memory_space<smem>>
    %39 = vector.broadcast %38 : f32 to vector<1x4xf32>
    %40 = arith.mulf %37, %39 : vector<1x4xf32>
    %c1_18 = arith.constant 1 : index
    %41 = memref.load %arg9[%c1_18] : memref<4xf32, #tpu.memory_space<smem>>
    %42 = vector.broadcast %41 : f32 to vector<1x4xf32>
    %43 = arith.addf %40, %42 : vector<1x4xf32>
    %44 = vector.shape_cast %43 : vector<1x4xf32> to vector<1x4x1xf32>
    %45 = vector.broadcast %44 : vector<1x4x1xf32> to vector<1x4x256xf32>
    %46 = arith.mulf %0, %45 : vector<1x4x256xf32>
    %47 = vector.extract_strided_slice %16 {offsets = [0, 12], sizes = [1, 4], strides = [1, 1]} : vector<1x16xf32> to vector<1x4xf32>
    %c3 = arith.constant 3 : index
    %48 = memref.load %arg8[%c3] : memref<4xf32, #tpu.memory_space<smem>>
    %49 = vector.broadcast %48 : f32 to vector<1x4xf32>
    %50 = arith.mulf %47, %49 : vector<1x4xf32>
    %c3_19 = arith.constant 3 : index
    %51 = memref.load %arg9[%c3_19] : memref<4xf32, #tpu.memory_space<smem>>
    %52 = vector.broadcast %51 : f32 to vector<1x4xf32>
    %53 = arith.addf %50, %52 : vector<1x4xf32>
    %54 = vector.shape_cast %53 : vector<1x4xf32> to vector<1x4x1xf32>
    %55 = vector.broadcast %54 : vector<1x4x1xf32> to vector<1x4x256xf32>
    %56 = arith.addf %46, %55 : vector<1x4x256xf32>
    %57 = arith.maximumf %36, %56 : vector<1x4x256xf32>
    %c0_20 = arith.constant 0 : index
    %c0_21 = arith.constant 0 : index
    %58 = vector.load %arg6[%c0_20, %c0_21] : memref<4x1xf32, #tpu.memory_space<vmem>>, vector<4x1xf32>
    %59 = vector.shape_cast %58 : vector<4x1xf32> to vector<1x4x1xf32>
    %60 = vector.broadcast %59 : vector<1x4x1xf32> to vector<1x4x256xf32>
    %61 = arith.mulf %0, %60 : vector<1x4x256xf32>
    %cst_22 = arith.constant dense<0.000000e+00> : vector<1x256xf32>
    %62 = vector.multi_reduction <add>, %61, %cst_22 [1] : vector<1x4x256xf32> to vector<1x256xf32>
    %c0_23 = arith.constant 0 : index
    %63 = memref.load %arg7[%c0_23] : memref<1xf32, #tpu.memory_space<smem>>
    %64 = vector.broadcast %63 : f32 to vector<1x256xf32>
    %65 = arith.addf %62, %64 : vector<1x256xf32>
    %cst_24 = arith.constant 1.000000e-01 : f32
    %66 = vector.broadcast %cst_24 : f32 to vector<1x256xf32>
    %67 = arith.mulf %65, %66 : vector<1x256xf32>
    %68 = tpu.iota {dimensions = array<i32: 0>} : vector<256x128xi32>
    %69 = tpu.iota {dimensions = array<i32: 1>} : vector<256x128xi32>
    %c64_i32 = arith.constant 64 : i32
    %70 = vector.broadcast %c64_i32 : i32 to vector<256x128xi32>
    %71 = arith.muli %69, %70 : vector<256x128xi32>
    %72 = arith.cmpi sge, %68, %71 : vector<256x128xi32>
    %c1_i32 = arith.constant 1 : i32
    %73 = vector.broadcast %c1_i32 : i32 to vector<256x128xi32>
    %74 = arith.addi %69, %73 : vector<256x128xi32>
    %c64_i32_25 = arith.constant 64 : i32
    %75 = vector.broadcast %c64_i32_25 : i32 to vector<256x128xi32>
    %76 = arith.muli %74, %75 : vector<256x128xi32>
    %77 = arith.cmpi slt, %68, %76 : vector<256x128xi32>
    %78 = arith.andi %72, %77 : vector<256x128xi1>
    %cst_26 = arith.constant 1.000000e+00 : f32
    %cst_27 = arith.constant 0.000000e+00 : f32
    %79 = vector.broadcast %cst_26 : f32 to vector<256x128xf32>
    %80 = vector.broadcast %cst_27 : f32 to vector<256x128xf32>
    %81 = arith.select %78, %79, %80 : vector<256x128xi1>, vector<256x128xf32>
    %82 = tpu.iota {dimensions = array<i32: 1>} : vector<128x256xi32>
    %83 = tpu.iota {dimensions = array<i32: 0>} : vector<128x256xi32>
    %c64_i32_28 = arith.constant 64 : i32
    %84 = vector.broadcast %c64_i32_28 : i32 to vector<128x256xi32>
    %85 = arith.muli %83, %84 : vector<128x256xi32>
    %86 = arith.cmpi sge, %82, %85 : vector<128x256xi32>
    %c1_i32_29 = arith.constant 1 : i32
    %87 = vector.broadcast %c1_i32_29 : i32 to vector<128x256xi32>
    %88 = arith.addi %83, %87 : vector<128x256xi32>
    %c64_i32_30 = arith.constant 64 : i32
    %89 = vector.broadcast %c64_i32_30 : i32 to vector<128x256xi32>
    %90 = arith.muli %88, %89 : vector<128x256xi32>
    %91 = arith.cmpi slt, %82, %90 : vector<128x256xi32>
    %92 = arith.andi %86, %91 : vector<128x256xi1>
    %cst_31 = arith.constant 1.000000e+00 : f32
    %cst_32 = arith.constant 0.000000e+00 : f32
    %93 = vector.broadcast %cst_31 : f32 to vector<128x256xf32>
    %94 = vector.broadcast %cst_32 : f32 to vector<128x256xf32>
    %95 = arith.select %92, %93, %94 : vector<128x256xi1>, vector<128x256xf32>
    %cst_33 = arith.constant dense<0.000000e+00> : vector<1x128xf32>
    %96 = tpu.matmul %67, %81, %cst_33 {dimension_numbers = #tpu.dot_dimension_numbers<[1], [0], [0], [1], [0, 0, 1, 1], [], []>} : vector<1x256xf32>, vector<256x128xf32>, vector<1x128xf32> -> vector<1x128xf32>
    %cst_34 = arith.constant 1.562500e-02 : f32
    %97 = vector.broadcast %cst_34 : f32 to vector<1x128xf32>
    %98 = arith.mulf %96, %97 : vector<1x128xf32>
    %cst_35 = arith.constant dense<0.000000e+00> : vector<1x256xf32>
    %99 = tpu.matmul %98, %95, %cst_35 {dimension_numbers = #tpu.dot_dimension_numbers<[1], [0], [0], [1], [0, 0, 1, 1], [], []>} : vector<1x128xf32>, vector<128x256xf32>, vector<1x256xf32> -> vector<1x256xf32>
    %100 = arith.subf %67, %99 : vector<1x256xf32>
    %101 = math.exp %100 : vector<1x256xf32>
    %cst_36 = arith.constant dense<0.000000e+00> : vector<1x128xf32>
    %102 = tpu.matmul %101, %81, %cst_36 {dimension_numbers = #tpu.dot_dimension_numbers<[1], [0], [0], [1], [0, 0, 1, 1], [], []>} : vector<1x256xf32>, vector<256x128xf32>, vector<1x128xf32> -> vector<1x128xf32>
    %cst_37 = arith.constant dense<0.000000e+00> : vector<1x256xf32>
    %103 = tpu.matmul %102, %95, %cst_37 {dimension_numbers = #tpu.dot_dimension_numbers<[1], [0], [0], [1], [0, 0, 1, 1], [], []>} : vector<1x128xf32>, vector<128x256xf32>, vector<1x256xf32> -> vector<1x256xf32>
    %cst_38 = arith.constant 1.000000e-30 : f32
    %104 = vector.broadcast %cst_38 : f32 to vector<1x256xf32>
    %105 = arith.maximumf %103, %104 : vector<1x256xf32>
    %cst_39 = arith.constant 85.3333359 : f32
    %106 = vector.broadcast %cst_39 : f32 to vector<1x256xf32>
    %107 = arith.mulf %106, %101 : vector<1x256xf32>
    %108 = tpu.reciprocal %105 : vector<1x256xf32> -> vector<1x256xf32>
    %109 = arith.mulf %107, %108 : vector<1x256xf32>
    %cst_40 = arith.constant 0.000000e+00 : f32
    %cst_41 = arith.constant 1.000000e+00 : f32
    %110 = vector.broadcast %cst_40 : f32 to vector<1x256xf32>
    %111 = arith.maximumf %110, %109 : vector<1x256xf32>
    %112 = vector.broadcast %cst_41 : f32 to vector<1x256xf32>
    %113 = arith.minimumf %112, %111 : vector<1x256xf32>
    %114 = vector.shape_cast %113 : vector<1x256xf32> to vector<1x1x256xf32>
    %115 = vector.broadcast %114 : vector<1x1x256xf32> to vector<1x4x256xf32>
    %116 = arith.mulf %57, %115 : vector<1x4x256xf32>
    %c0_42 = arith.constant 0 : index
    %c0_43 = arith.constant 0 : index
    %c0_44 = arith.constant 0 : index
    %117 = vector.load %arg10[%c0_42, %c0_43, %c0_44] : memref<1x4x256xf32, #tpu.memory_space<vmem>>, vector<1x4x256xf32>
    tpu.vector_store %arg10[%c0_42, %c0_43, %c0_44], %116 {strides = array<i32>} : memref<1x4x256xf32, #tpu.memory_space<vmem>>, vector<1x4x256xf32>,
    return
  }
  func.func @transform_0(%arg0: i32) -> (i32, i32, i32) {
    %c0_i32 = arith.constant 0 : i32
    %c0_i32_0 = arith.constant 0 : i32
    %c0_i32_1 = arith.constant 0 : i32
    return %arg0, %c0_i32, %c0_i32_0 : i32, i32, i32
  }
  func.func @transform_1(%arg0: i32) -> (i32, i32) {
    %c0_i32 = arith.constant 0 : i32
    %c0_i32_0 = arith.constant 0 : i32
    %c0_i32_1 = arith.constant 0 : i32
    return %c0_i32, %c0_i32_0 : i32, i32
  }
  func.func @transform_2(%arg0: i32) -> (i32, i32) {
    %c0_i32 = arith.constant 0 : i32
    %c0_i32_0 = arith.constant 0 : i32
    %c0_i32_1 = arith.constant 0 : i32
    return %c0_i32, %c0_i32_0 : i32, i32
  }
  func.func @transform_3(%arg0: i32) -> (i32, i32) {
    %c0_i32 = arith.constant 0 : i32
    %c0_i32_0 = arith.constant 0 : i32
    %c0_i32_1 = arith.constant 0 : i32
    return %c0_i32, %c0_i32_0 : i32, i32
  }
  func.func @transform_4(%arg0: i32) -> (i32, i32) {
    %c0_i32 = arith.constant 0 : i32
    %c0_i32_0 = arith.constant 0 : i32
    %c0_i32_1 = arith.constant 0 : i32
    return %c0_i32, %c0_i32_0 : i32, i32
  }
  func.func @transform_5(%arg0: i32) -> (i32, i32) {
    %c0_i32 = arith.constant 0 : i32
    %c0_i32_0 = arith.constant 0 : i32
    %c0_i32_1 = arith.constant 0 : i32
    return %c0_i32, %c0_i32_0 : i32, i32
  }
  func.func @transform_6(%arg0: i32) -> i32 {
    %c0_i32 = arith.constant 0 : i32
    %c0_i32_0 = arith.constant 0 : i32
    return %c0_i32 : i32
  }
  func.func @transform_7(%arg0: i32) -> i32 {
    %c0_i32 = arith.constant 0 : i32
    %c0_i32_0 = arith.constant 0 : i32
    return %c0_i32 : i32
  }
  func.func @transform_8(%arg0: i32) -> i32 {
    %c0_i32 = arith.constant 0 : i32
    %c0_i32_0 = arith.constant 0 : i32
    return %c0_i32 : i32
  }
  func.func @transform_9(%arg0: i32) -> (i32, i32, i32) {
    %c0_i32 = arith.constant 0 : i32
    %c0_i32_0 = arith.constant 0 : i32
    %c0_i32_1 = arith.constant 0 : i32
    return %arg0, %c0_i32, %c0_i32_0 : i32, i32, i32
  }
}

</mosaic_0001>

<bundles_post_ra>
// kernel: tpu_custom_call.1
= control target key start
LH: loop header
LB: loop body
LE: loop exit
PB: predicated region body
PF: predicated region fallthrough
CT: control target
= control target key end

     0   :  { %s3434_s0 = inlined_call_operand.hbm [shape: f32[2,4,256], index: 0, kind: input, shape index: {}]   ;;  %s3435_s1 = inlined_call_operand.vmem [shape: f32[4,1], index: 1, kind: input, shape index: {}]   ;;  %s3436_s2 = inlined_call_operand.<no memory space> [shape: f32[1,1], index: 2, kind: input, shape index: {}]   ;;  %s3437_s3 = inlined_call_operand.vmem [shape: f32[1,16], index: 3, kind: input, shape index: {}]   ;;  %s3438_s4 = inlined_call_operand.vmem [shape: f32[1,16], index: 4, kind: input, shape index: {}]   ;;  %s3439_s5 = inlined_call_operand.vmem [shape: f32[4,1], index: 5, kind: input, shape index: {}]   ;;  %s3440_s6 = inlined_call_operand.<no memory space> [shape: f32[1], index: 6, kind: input, shape index: {}]   ;;  %s3441_s7 = inlined_call_operand.vmem [shape: f32[4], index: 7, kind: input, shape index: {}]   ;;  %s3442_s8 = inlined_call_operand.vmem [shape: f32[4], index: 8, kind: input, shape index: {}]   ;;  %s3443_s9 = inlined_call_operand.hbm [shape: f32[2,4,256], index: 9, kind: output, shape index: {}]  }
   0x1   :  { %3579 = sst [smem:[#allocation29_spill]] %s3441_s7  ;;  %v14_v0 = vstv %s3436_s2 }
   0x2   :  { %16 = sst [smem:[#allocation3]] %s3440_s6  ;;  %15 = vst [vmem:[#allocation2] sm:$0x1] %v14_v0 }
   0x3   :  { %17 = vsyncpa [#allocation5], 0 }
   0x4   :  { %19 = vsyncpa [#allocation5 + $0x1], 0 }
   0x5   :  { %20 = vsyncpa [#allocation7], 0 }
   0x6   :  { %21 = vsyncpa [#allocation10], 0 }
   0x7   :  { %22 = vsyncpa [#allocation6], 0 }
   0x8   :  { %24 = vsyncpa [#allocation6 + $0x1], 0  ;;  %s1693_s13 = smov 0   ;;  %s1695_s14 = smov 0  }
   0x9   :  { %s1697_s15 = smov 0   ;;  %s1699_s16 = smov 0  }
   0xa LB: > { %s1714_s2 = sadd.s32 4294967295, %s1629_s16   ;;  %s1249_s6 = sadd.s32 4294967294, %s1629_s16   ;;  %s1629_s16 = sphi %s1699_s16, %s3974_s16   ;;  %s1625_s15 = sphi %s1697_s15, %s3973_s15   ;;  %s1621_s14 = sphi %s1695_s14, %s3972_s14   ;;  %s1617_s13 = sphi %s1693_s13, %s3971_s13  }
   0xb   : > { %p50_p0 = scmp.ne.s32.totalorder %s1621_s14, %s1617_s13  ;;  %p51_p1 = scmp.eq.s32.totalorder %s1714_s2, 0 }
   0xc   : > { %p242_p2 = scmp.eq.s32.totalorder %s1714_s2, 1  ;;  %p248_p3 = scmp.eq.s32.totalorder %s1249_s6, 1 }
   0xd   : > { %p1723_p4 = por %p51_p1, %p50_p0  ;;  %p1250_p5 = scmp.ge.s32.totalorder %s1629_s16, 1 }
   0xe   : > { %p1728_p6 = por %p248_p3, %p50_p0  ;;  %p255_p7 = scmp.lt.s32.totalorder %s1629_s16, 3 }
   0xf   : > { %s3582_s7 = sld [smem:[#allocation29_spill]]  ;;  %s295_s25 = sshll.u32 %s3442_s8, 4  ;;  %s296_s25 = int_to_ptr.vmem [resolvable:$true] %s295_s25 }
  0x10   : > { %p1736_p8 = pnand %p1250_p5, %p255_p7  ;;  %s1749_s26 = sadd.s32 1, %s1629_s16  }
  0x11   : > { %s34_s27 = ssub.s32 %s1629_s16, %s1749_s26  ;;  %s1631_s28 = smov [#allocation8]  }
  0x12   : > { %p1419_p10 = pneg %p1736_p8  ;;  %s1632_s29 = smov [#allocation9]  }
  0x13   : > { %p35_p12 = scmp.eq.s32.totalorder %s34_s27, 0  ;;  %s37_s30 = sadd.s32 1, %s1625_s15 }
  0x14   : > { %p1420_p11 = pnand %p1419_p10, %p51_p1  ;;  %p44_p13 = scmp.ne.s32.totalorder %s1625_s15, %s1621_s14 }
  0x15   : > { %s285_s21 = sshll.u32 %s3582_s7, 4  ;;  %p45_p0 = scmp.eq.s32.totalorder %s1629_s16, 0  ;;  %s286_s21 = int_to_ptr.vmem [resolvable:$true] %s285_s21 }
  0x16   : > { %1422 = dma.vmem_to_smem (!%p1420_p11), %s286_s21, 16, %s1631_s28, [#allocation7]  }
  0x17   : > { %1425 = dma.vmem_to_smem (!%p1420_p11), %s296_s25, 16, %s1632_s29, [#allocation10]  }
  0x18   : > { %s1758_s10 = scalar_select %p35_p12, %s1625_s15, %s37_s30  }
  0x19   : > { %p46_p3 = por %p45_p0, %p44_p13  ;;  %p1762_p5 = por %p242_p2, %p44_p13 }
  0x1a   : > { %p1436_p7 = scmp.lt.s32.totalorder %s1629_s16, 2  ;;  %s306_s12 = sand.u32 1, %s1625_s15  }
  0x1b   : > { %s1254_s6 = sshll.u32 %s306_s12, 3  ;;  %s1405_s19 = sshll.u32 %s1629_s16, 3 }
  0x1c   : > { %s315_s23 = scalar_lea.hbm %s3434_s0, %s1405_s19  ;;  %s310_s24 = scalar_lea.vmem [#allocation4], %s1254_s6 }
  0x1d   : > { %s319_s25 = sshll.u32 %s310_s24, 4  ;;  %s317_s27 = sshll.u32 %s315_s23, 4  ;;  %s320_s25 = int_to_ptr.vmem [resolvable:$true] %s319_s25  ;;  %s318_s27 = int_to_ptr.hbm [resolvable:$true] %s317_s27 }
  0x1e   : > { %p1772_p10 = pnand %p1436_p7, %p46_p3  ;;  %s307_s29 = scalar_lea.sflag [#allocation5], %s306_s12 }
  0x1f   : > { %s1525_s30 = sshra.s32 %s318_s27, 4  ;;  %s1532_s20 = scalar_lea.hbm %s3434_s0, 16  ;;  %s1526_s30 = int_to_ptr.hbm [resolvable:$true] %s1525_s30 }
  0x20   : > { %s1527_s7 = scalar_lea.hbm %s1526_s30, 8  ;;  %p1529_p11 = pneg %p1772_p10 }
  0x21   : > { %p1528_p2 = scmp.ne.s32.totalorder %s1526_s30, %s1527_s7  ;;  %p1533_p0 = scmp.lt.s32.totalorder %s1526_s30, %s3434_s0 }
  0x22   : > { %p1534_p3 = scmp.lt.s32.totalorder %s1532_s20, %s1527_s7 }
  0x23   : > { %p1530_p12 = pnand %p1529_p11, %p1528_p2 }
  0x24   : > { %p1535_p7 = por %p1534_p3, %p1533_p0 }
  0x25   : > { %p1531_p13 = pneg %p1530_p12 }
  0x27   : > { %p1536_p9 = pnand %p1535_p7, %p1531_p13 }
  0x29   : > { %1539 = shalt.err (!%p1536_p9)
}
  0x2a   : > { %1429 = dma.hbm_to_vmem [thread:$0]  (!%p1772_p10), %s318_s27, 128, %s320_s25, %s307_s29  }
  0x2b   : > { %328 = sbr.rel (%p1736_p8) target bundleno = 793 (0x319), region = 56 }
  0x30   : > { %s1789_s12 = sand.u32 1, %s1621_s14  }
  0x31   : > { %s1258_s24 = sshll.u32 %s1789_s12, 3  ;;  %s331_s19 = scalar_lea.sflag [#allocation5], %s1789_s12 }
  0x32   : > { %s334_s7 = scalar_lea.vmem [#allocation4], %s1258_s24 }
  0x33   : > { %1600 = dma.done.wait (%p1723_p4), %s331_s19, 128  }
  0x34   : > { %1602 = vsyncadd (%p1723_p4), %s331_s19, 4294967168 }
  0x35   : > { %1604 = dma.done.wait (%p51_p1), [#allocation7], 16  }
  0x36   : > { %1606 = vsyncadd (%p51_p1), [#allocation7], 4294967280 }
  0x37   : > { %1608 = dma.done.wait (%p51_p1), [#allocation10], 16  }
  0x38   : > { %1610 = vsyncadd (%p51_p1), [#allocation10], 4294967280 }
  0x39   : > { %350 = sfence }
  0x3a   : > { %v548_v1 = vld [vmem:[%s3439_s5] sm:$0xf]  ;;  %v1810_v2 = vld [vmem:[%s334_s7] sm:$0xff]  ;;  %v1633_v3 = vmov 0   ;;  %v405_v4 = vlaneseq  ;;  %v3501_v13 = vmov 1.0   ;;  %vm3444_vm6 = vcmask 1043456  }
  0x3b   : > { %3586 = vst [vmem:[#allocation16_spill] sm:$0xff] %v1810_v2  ;;  %1478 = vset.pattern.permute.xlu0 %v1633_v3  ;;  %v3596_v28 = vmov 0  ;;  %v3598_v29 = vmov 0  ;;  %v3600_v32 = vmov 0  ;;  %v3602_v37 = vmov 0  ;;  %s2251_s17 = sld [smem:[#allocation3]] }
  0x3c   : > { %383 = vst [vmem:[#allocation1] ss:$2 sm:$0xff] %v1810_v2  ;;  %551 = vperm.xlu0 %1478, %v548_v1   ;;  %v1813_v5 = vand.u32 127, %v405_v4  ;;  %v1815_v6 = vshrl.u32 %v405_v4, 7  ;;  %v3604_v38 = vmov 0  ;;  %v3606_v39 = vmov 0 }
  0x3d   : > { %v3608_v40 = vmov 0  ;;  %v3611_v45 = vmov 0  ;;  %v3613_v48 = vmov 0  ;;  %v3616_v49 = vmov 0  ;;  %s1266_s21 = sld [smem:[#allocation8 + $0x2]]  ;;  %s1406_s28 = sshll.u32 %s1714_s2, 3 }
  0x3e   : > { %3587 = vst [vmem:[#allocation17_spill] sm:$0xff] %v1815_v6  ;;  %v1818_v7 = vadd.s32 120, %v1815_v6  ;;  %v1821_v8 = vmul.u32 64, %v1813_v5  ;;  %v651_v9 = vadd.s32 1, %v1813_v5  ;;  %v617_v10 = vadd.s32 248, %v1815_v6  ;;  %1479 = vset.pattern.permute.xlu1 %v1815_v6  ;;  %s467_s23 = sld [smem:[#allocation8]]  ;;  %s1152_s6 = scalar_lea.hbm %s3443_s9, %s1406_s28 }
  0x3f   : > { %v1851_v20 = vadd.s32 112, %v1815_v6  ;;  %v616_v21 = vadd.s32 240, %v1815_v6  ;;  %v1865_v23 = vadd.s32 104, %v1815_v6  ;;  %v615_v24 = vadd.s32 232, %v1815_v6  ;;  %s1267_s19 = sld [smem:[#allocation9 + $0x2]]  ;;  %s380_s2 = scalar_lea.vmem [#allocation11], %s1258_s24 }
  0x40   : > { %vm634_vm0 = vcmp.ge.s32.totalorder %v1818_v7, %v1821_v8  ;;  %v1828_v11 = vmul.u32 64, %v651_v9  ;;  %vm650_vm1 = vcmp.ge.s32.totalorder %v617_v10, %v1821_v8  ;;  %v1876_v26 = vadd.s32 96, %v1815_v6  ;;  %s470_s7 = sld [smem:[#allocation9]]  ;;  %s1154_s20 = sshll.u32 %s380_s2, 4  ;;  %s1155_s20 = int_to_ptr.vmem [resolvable:$true] %s1154_s20 }
  0x41   : > { %vm633_vm7 = vcmp.ge.s32.totalorder %v1851_v20, %v1821_v8  ;;  %vm649_vm9 = vcmp.ge.s32.totalorder %v616_v21, %v1821_v8  ;;  %v614_v27 = vadd.s32 224, %v1815_v6  ;;  %vm632_vm13 = vcmp.ge.s32.totalorder %v1865_v23, %v1821_v8  ;;  %s1270_s22 = sld [smem:[#allocation8 + $0x3]]  ;;  %s1575_s24 = scalar_lea.hbm %s3443_s9, 16 }
  0x42   : > { %vm668_vm2 = vcmp.lt.s32.totalorder %v1818_v7, %v1828_v11  ;;  %vm684_vm3 = vcmp.lt.s32.totalorder %v617_v10, %v1828_v11  ;;  %vm667_vm8 = vcmp.lt.s32.totalorder %v1851_v20, %v1828_v11  ;;  %vm683_vm11 = vcmp.lt.s32.totalorder %v616_v21, %v1828_v11  ;;  %s1268_s25 = sld [smem:[#allocation8 + $0x1]] }
  0x43   : > { %vm1834_vm4 = vmand %vm634_vm0, %vm668_vm2  ;;  %v384_v15 = vld.sshfl [vmem:[#allocation1] sm:$0xff pattern:$0x75316420]  ;;  %v385_v16 = vld.sshfl [vmem:[#allocation1 + $0x8] sm:$0xff pattern:$0x75316420]  ;;  %vm666_vm14 = vcmp.lt.s32.totalorder %v1865_v23, %v1828_v11  ;;  %vm648_vm15 = vcmp.ge.s32.totalorder %v615_v24, %v1821_v8  ;;  %vm682_vm0 = vcmp.lt.s32.totalorder %v615_v24, %v1828_v11  ;;  %vm631_vm2 = vcmp.ge.s32.totalorder %v1876_v26, %v1821_v8 }
  0x44   : > { %1272 = vmatpush.msk.msra.mxu2 %vm1834_vm4, %v3501_v13  ;;  %vm1841_vm5 = vmand %vm650_vm1, %vm684_vm3  ;;  %v389_v17 = vsel %vm3444_vm6, %v384_v15, 0.0  ;;  %v390_v18 = vsel %vm3444_vm6, %v385_v16, 0.0  ;;  %vm665_vm3 = vcmp.lt.s32.totalorder %v1876_v26, %v1828_v11  ;;  %v1906_v30 = vadd.s32 88, %v1815_v6  ;;  %s1269_s27 = sld [smem:[#allocation9 + $0x1]] }
  0x45   : > { %1288 = vmatpush.msk.msra.mxu3 %vm1841_vm5, %v3501_v13  ;;  %v391_v19 = vadd.f32 %v390_v18, %v389_v17  ;;  %vm1859_vm10 = vmand %vm633_vm7, %vm667_vm8  ;;  %vm647_vm7 = vcmp.ge.s32.totalorder %v614_v27, %v1821_v8  ;;  %vm681_vm8 = vcmp.lt.s32.totalorder %v614_v27, %v1828_v11  ;;  %v613_v31 = vadd.s32 216, %v1815_v6 }
  0x46   : > { %1273 = vmatpush.msk.msra.mxu2 %vm1859_vm10, %v3501_v13  ;;  %vm1871_vm12 = vmand %vm649_vm9, %vm683_vm11  ;;  %v1917_v33 = vadd.s32 80, %v1815_v6  ;;  %v612_v34 = vadd.s32 208, %v1815_v6  ;;  %v1921_v35 = vadd.s32 72, %v1815_v6  ;;  %v611_v36 = vadd.s32 200, %v1815_v6 }
  0x47   : > { %1289 = vmatpush.msk.msra.mxu3 %vm1871_vm12, %v3501_v13  ;;  %vm1888_vm1 = vmand %vm632_vm13, %vm666_vm14  ;;  %vm630_vm14 = vcmp.ge.s32.totalorder %v1906_v30, %v1821_v8  ;;  %v1971_v41 = vadd.s32 64, %v1815_v6  ;;  %v610_v42 = vadd.s32 192, %v1815_v6  ;;  %v1975_v43 = vadd.s32 56, %v1815_v6 }
  0x48   : > { %v3597_v28 = vsel %vm1888_vm1, 4294967295, %v3596_v28  ;;  %1274 = vmatpush.msk.msra.mxu2 %vm1888_vm1, %v3501_v13  ;;  %vm1901_vm9 = vmand %vm648_vm15, %vm682_vm0  ;;  %vm664_vm15 = vcmp.lt.s32.totalorder %v1906_v30, %v1828_v11  ;;  %vm646_vm0 = vcmp.ge.s32.totalorder %v613_v31, %v1821_v8  ;;  %vm678_vm6 = vcmp.lt.s32.totalorder %v611_v36, %v1828_v11 }
  0x49   : > { %v3599_v29 = vsel %vm1901_vm9, 4294967295, %v3598_v29  ;;  %1290 = vmatpush.msk.msra.mxu3 %vm1901_vm9, %v3501_v13  ;;  %vm1912_vm11 = vmand %vm631_vm2, %vm665_vm3  ;;  %vm680_vm2 = vcmp.lt.s32.totalorder %v613_v31, %v1828_v11  ;;  %v609_v44 = vadd.s32 184, %v1815_v6  ;;  %v1988_v46 = vadd.s32 48, %v1815_v6 }
  0x4a   : > { %v3601_v32 = vsel %vm1912_vm11, 4294967295, %v3600_v32  ;;  %1275 = vmatpush.msk.msra.mxu2 %vm1912_vm11, %v3501_v13  ;;  %vm1927_vm13 = vmand %vm647_vm7, %vm681_vm8  ;;  %vm629_vm7 = vcmp.ge.s32.totalorder %v1917_v33, %v1821_v8  ;;  %vm663_vm8 = vcmp.lt.s32.totalorder %v1917_v33, %v1828_v11  ;;  %vm679_vm11 = vcmp.lt.s32.totalorder %v612_v34, %v1828_v11 }
  0x4b   : > { %v3603_v37 = vsel %vm1927_vm13, 4294967295, %v3602_v37  ;;  %1291 = vmatpush.msk.msra.mxu3 %vm1927_vm13, %v3501_v13  ;;  %vm1940_vm3 = vmand %vm630_vm14, %vm664_vm15  ;;  %vm628_vm14 = vcmp.ge.s32.totalorder %v1921_v35, %v1821_v8  ;;  %vm662_vm15 = vcmp.lt.s32.totalorder %v1921_v35, %v1828_v11  ;;  %v608_v47 = vadd.s32 176, %v1815_v6 }
  0x4c   : > { %v3605_v38 = vsel %vm1940_vm3, 4294967295, %v3604_v38  ;;  %1276 = vmatpush.msk.msra.mxu2 %vm1940_vm3, %v3501_v13  ;;  %vm1953_vm9 = vmand %vm646_vm0, %vm680_vm2  ;;  %vm3610_vm0 = vcmp.ge.s32.totalorder %v612_v34, %v1821_v8  ;;  %vm677_vm13 = vcmp.lt.s32.totalorder %v610_v42, %v1828_v11  ;;  %v2023_v50 = vadd.s32 40, %v1815_v6 }
  0x4d   : > { %v3607_v39 = vsel %vm1953_vm9, 4294967295, %v3606_v39  ;;  %1292 = vmatpush.msk.msra.mxu3 %vm1953_vm9, %v3501_v13  ;;  %vm1966_vm1 = vmand %vm629_vm7, %vm663_vm8  ;;  %vm661_vm8 = vcmp.lt.s32.totalorder %v1971_v41, %v1828_v11  ;;  %v3618_v51 = vmov 0  ;;  %v607_v52 = vadd.s32 168, %v1815_v6 }
  0x4e   : > { %v3609_v40 = vsel %vm1966_vm1, 4294967295, %v3608_v40  ;;  %1277 = vmatpush.msk.msra.mxu2 %vm1966_vm1, %v3501_v13  ;;  %vm1983_vm2 = vmand %vm3610_vm0, %vm679_vm11  ;;  %vm627_vm11 = vcmp.ge.s32.totalorder %v1971_v41, %v1821_v8  ;;  %vm643_vm0 = vcmp.ge.s32.totalorder %v610_v42, %v1821_v8  ;;  %vm660_vm1 = vcmp.lt.s32.totalorder %v1975_v43, %v1828_v11 }
  0x4f   : > { %v3612_v45 = vsel %vm1983_vm2, 4294967295, %v3611_v45  ;;  %1293 = vmatpush.msk.msra.mxu3 %vm1983_vm2, %v3501_v13  ;;  %vm1997_vm7 = vmand %vm628_vm14, %vm662_vm15  ;;  %vm3615_vm14 = vcmp.ge.s32.totalorder %v611_v36, %v1821_v8  ;;  %vm626_vm2 = vcmp.ge.s32.totalorder %v1975_v43, %v1821_v8  ;;  %v3620_v53 = vmov 0 }
  0x50   : > { %v3614_v48 = vsel %vm1997_vm7, 4294967295, %v3613_v48  ;;  %1278 = vmatpush.msk.msra.mxu2 %vm1997_vm7, %v3501_v13  ;;  %vm2014_vm15 = vmand %vm3615_vm14, %vm678_vm6  ;;  %vm642_vm6 = vcmp.ge.s32.totalorder %v609_v44, %v1821_v8  ;;  %vm676_vm14 = vcmp.lt.s32.totalorder %v609_v44, %v1828_v11  ;;  %v3622_v54 = vmov 0 }
  0x51   : > { %v3617_v49 = vsel %vm2014_vm15, 4294967295, %v3616_v49  ;;  %1294 = vmatpush.msk.msra.mxu3 %vm2014_vm15, %v3501_v13  ;;  %vm2028_vm7 = vmand %vm627_vm11, %vm661_vm8  ;;  %vm625_vm11 = vcmp.ge.s32.totalorder %v1988_v46, %v1821_v8  ;;  %vm659_vm8 = vcmp.lt.s32.totalorder %v1988_v46, %v1828_v11  ;;  %v2056_v55 = vadd.s32 32, %v1815_v6 }
  0x52   : > { %v3619_v51 = vsel %vm2028_vm7, 4294967295, %v3618_v51  ;;  %1279 = vmatpush.msk.msra.mxu2 %vm2028_vm7, %v3501_v13  ;;  %vm2038_vm9 = vmand %vm643_vm0, %vm677_vm13  ;;  %vm675_vm13 = vcmp.lt.s32.totalorder %v608_v47, %v1828_v11  ;;  %v606_v56 = vadd.s32 160, %v1815_v6  ;;  %v3624_v57 = vmov 0 }
  0x53   : > { %v3621_v53 = vsel %vm2038_vm9, 4294967295, %v3620_v53  ;;  %1295 = vmatpush.msk.msra.mxu3 %vm2038_vm9, %v3501_v13  ;;  %vm2049_vm15 = vmand %vm626_vm2, %vm660_vm1  ;;  %vm624_vm1 = vcmp.ge.s32.totalorder %v2023_v50, %v1821_v8  ;;  %vm658_vm2 = vcmp.lt.s32.totalorder %v2023_v50, %v1828_v11  ;;  %v2071_v58 = vadd.s32 24, %v1815_v6 }
  0x54   : > { %v3623_v54 = vsel %vm2049_vm15, 4294967295, %v3622_v54  ;;  %1280 = vmatpush.msk.msra.mxu2 %vm2049_vm15, %v3501_v13  ;;  %vm2062_vm0 = vmand %vm642_vm6, %vm676_vm14  ;;  %v3626_v59 = vmov 0  ;;  %vm674_vm14 = vcmp.lt.s32.totalorder %v607_v52, %v1828_v11  ;;  %v605_v60 = vadd.s32 152, %v1815_v6 }
  0x55   : > { %v3625_v57 = vsel %vm2062_vm0, 4294967295, %v3624_v57  ;;  %1296 = vmatpush.msk.msra.mxu3 %vm2062_vm0, %v3501_v13  ;;  %vm2076_vm7 = vmand %vm625_vm11, %vm659_vm8  ;;  %vm3628_vm15 = vcmp.ge.s32.totalorder %v608_v47, %v1821_v8  ;;  %v3629_v61 = vmov 0  ;;  %vm623_vm11 = vcmp.ge.s32.totalorder %v2056_v55, %v1821_v8 }
  0x56   : > { %v3627_v59 = vsel %vm2076_vm7, 4294967295, %v3626_v59  ;;  %1281 = vmatpush.msk.msra.mxu2 %vm2076_vm7, %v3501_v13  ;;  %vm2088_vm9 = vmand %vm3628_vm15, %vm675_vm13  ;;  %vm657_vm8 = vcmp.lt.s32.totalorder %v2056_v55, %v1828_v11  ;;  %v2097_v62 = vadd.s32 16, %v1815_v6  ;;  %v3631_v63 = vmov 0 }
  0x57   : > { %v3630_v61 = vsel %vm2088_vm9, 4294967295, %v3629_v61  ;;  %1297 = vmatpush.msk.msra.mxu3 %vm2088_vm9, %v3501_v13  ;;  %vm2102_vm6 = vmand %vm624_vm1, %vm658_vm2  ;;  %vm673_vm13 = vcmp.lt.s32.totalorder %v606_v56, %v1828_v11  ;;  %v604_v0 = vadd.s32 144, %v1815_v6  ;;  %v2110_v1 = vadd.s32 8, %v1815_v6 }
  0x58   : > { %v3632_v63 = vsel %vm2102_vm6, 4294967295, %v3631_v63  ;;  %1282 = vmatpush.msk.msra.mxu2 %vm2102_vm6, %v3501_v13  ;;  %vm3633_vm7 = vcmp.ge.s32.totalorder %v607_v52, %v1821_v8  ;;  %v3634_v3 = vmov 0  ;;  %vm622_vm1 = vcmp.ge.s32.totalorder %v2071_v58, %v1821_v8  ;;  %vm2128_vm15 = vmand %vm623_vm11, %vm657_vm8 }
  0x59   : > { %vm2117_vm9 = vmand %vm3633_vm7, %vm674_vm14  ;;  %vm656_vm2 = vcmp.lt.s32.totalorder %v2071_v58, %v1828_v11  ;;  %v3636_v4 = vmov 0  ;;  %vm638_vm6 = vcmp.ge.s32.totalorder %v605_v60, %v1821_v8  ;;  %vm672_vm7 = vcmp.lt.s32.totalorder %v605_v60, %v1828_v11  ;;  %1481 = vset.pattern.permute.xlu2 %v2110_v1 }
  0x5a   : > { %v3635_v3 = vsel %vm2117_vm9, 4294967295, %v3634_v3  ;;  %1298 = vmatpush.msk.msra.mxu3 %vm2117_vm9, %v3501_v13  ;;  %v3637_v4 = vsel %vm2128_vm15, 4294967295, %v3636_v4  ;;  %v603_v9 = vadd.s32 136, %v1815_v6  ;;  %1283 = vmatpush.msk.msra.mxu2 %vm2128_vm15, %v3501_v13  ;;  %vm3638_vm14 = vcmp.ge.s32.totalorder %v606_v56, %v1821_v8  ;;  %vm2152_vm9 = vmand %vm622_vm1, %vm656_vm2 }
  0x5b   : > { %vm2141_vm0 = vmand %vm3638_vm14, %vm673_vm13  ;;  %v3639_v10 = vmov 0  ;;  %vm621_vm11 = vcmp.ge.s32.totalorder %v2097_v62, %v1821_v8  ;;  %vm655_vm8 = vcmp.lt.s32.totalorder %v2097_v62, %v1828_v11  ;;  %v3641_v15 = vmov 0 }
  0x5c   : > { %v3640_v10 = vsel %vm2141_vm0, 4294967295, %v3639_v10  ;;  %1299 = vmatpush.msk.msra.mxu3 %vm2141_vm0, %v3501_v13  ;;  %v3642_v15 = vsel %vm2152_vm9, 4294967295, %v3641_v15  ;;  %vm637_vm15 = vcmp.ge.s32.totalorder %v604_v0, %v1821_v8  ;;  %vm671_vm13 = vcmp.lt.s32.totalorder %v604_v0, %v1828_v11  ;;  %1284 = vmatpush.msk.msra.mxu2 %vm2152_vm9, %v3501_v13  ;;  %vm2162_vm14 = vmand %vm638_vm6, %vm672_vm7 }
  0x5d   : > { %v602_v16 = vadd.s32 128, %v1815_v6  ;;  %vm620_vm1 = vcmp.ge.s32.totalorder %v2110_v1, %v1821_v8  ;;  %vm654_vm2 = vcmp.lt.s32.totalorder %v2110_v1, %v1828_v11  ;;  %v1635_v18 = vmov 839922192   ;;  %vm2173_vm0 = vmand %vm621_vm11, %vm655_vm8 }
  0x5e   : > { %1300 = vmatpush.msk.msra.mxu3 %vm2162_vm14, %v3501_v13  ;;  %v3645_v21 = vmov 0  ;;  %vm636_vm6 = vcmp.ge.s32.totalorder %v603_v9, %v1821_v8  ;;  %vm670_vm7 = vcmp.lt.s32.totalorder %v603_v9, %v1828_v11  ;;  %1285 = vmatpush.msk.msra.mxu2 %vm2173_vm0, %v3501_v13  ;;  %vm2182_vm9 = vmand %vm637_vm15, %vm671_vm13  ;;  %vm619_vm3 = vcmp.ge.s32.totalorder %v1815_v6, %v1821_v8 }
  0x5f   : > { %v3646_v21 = vsel %vm2173_vm0, 4294967295, %v3645_v21  ;;  %vm653_vm11 = vcmp.lt.s32.totalorder %v1815_v6, %v1828_v11  ;;  %vm2193_vm8 = vmand %vm620_vm1, %vm654_vm2  ;;  %vm635_vm0 = vcmp.ge.s32.totalorder %v602_v16, %v1821_v8  ;;  %vm669_vm15 = vcmp.lt.s32.totalorder %v602_v16, %v1828_v11 }
  0x60   : > { %1301 = vmatpush.msk.msra.mxu3 %vm2182_vm9, %v3501_v13  ;;  %1286 = vmatpush.msk.msra.mxu2 %vm2193_vm8, %v3501_v13  ;;  %vm2202_vm13 = vmand %vm636_vm6, %vm670_vm7  ;;  %v1636_v12 = vmov 256.0   ;;  %vm3664_vm6 = vnez %v3609_v40  ;;  %vm3665_vm7 = vnez %v3612_v45  ;;  %v2301_v52 = vadd.s32 1, %v1851_v20 }
  0x61   : > { %vm2211_vm1 = vmand %vm619_vm3, %vm653_vm11  ;;  %vm3659_vm3 = vnez %v3599_v29  ;;  %1483 = vrcp.f32 %v1636_v12  ;;  %vm3666_vm11 = vnez %v3614_v48  ;;  %v765_v48 = vmul.u32 64, %v1818_v7 }
  0x62   : > { %1302 = vmatpush.msk.msra.mxu3 %vm2202_vm13, %v3501_v13  ;;  %1287 = vmatpush.msk.msra.mxu2 %vm2211_vm1, %v3501_v13  ;;  %vm2218_vm2 = vmand %vm635_vm0, %vm669_vm15  ;;  %vm3663_vm0 = vnez %v3607_v39  ;;  %vm3667_vm15 = vnez %v3617_v49  ;;  %v580_v39 = vstv %s2251_s17  ;;  %v2294_v49 = vadd.s32 1, %v1818_v7  ;;  %s1271_s17 = sld [smem:[#allocation9 + $0x3]] }
  0x63   : > { %v3486_v9 = vmul.u32 64, %v2301_v52  ;;  %v3681_v16 = vmov 0  ;;  %v3474_v12 = vmul.u32 64, %v1906_v30  ;;  %v3487_v27 = vmul.u32 64, %v1975_v43 }
  0x64   : > { %1303 = vmatpush.msk.msra.mxu3 %vm2218_vm2, %v3501_v13  ;;  %1336 = vmatpush.msk.msrb.mxu2 %vm1834_vm4, %v3501_v13  ;;  %vm3658_vm4 = vnez %v3597_v28  ;;  %v829_v0 = vmul.u32 64, %v2294_v49  ;;  %v2505_v24 = vadd.s32 1, %v1975_v43  ;;  %v3715_v31 = vmov 0 }
  0x65   : > { %v3717_v36 = vmov 0  ;;  %v3733_v7 = vmov 0 }
  0x66   : > { %392 = vadd.xlane.f32.xlu0 %v391_v19  ;;  %v482_v19 = vunpack.c.l.s4 %v1635_v18  ;;  %1352 = vmatpush.msk.msrb.mxu3 %vm1841_vm5, %v3501_v13  ;;  %vm3660_vm5 = vnez %v3601_v32 }
  0x67   : > { %1337 = vmatpush.msk.msrb.mxu2 %vm1859_vm10, %v3501_v13  ;;  %vm3661_vm10 = vnez %v3603_v37  ;;  %v2268_v14 = vpop.eup %1483 }
  0x68   : > { %v2206_v34 = vunpack.c.0.s8 %v482_v19  ;;  %1353 = vmatpush.msk.msrb.mxu3 %vm1871_vm12, %v3501_v13  ;;  %vm3662_vm12 = vnez %v3605_v38  ;;  %v402_v38 = vld [vmem:[%s3435_s1] sm:$0xf]  ;;  %v2286_v40 = vmul.f32 256.0, %v2268_v14 }
  0x69   : > { %1338 = vmatpush.msk.msrb.mxu2 %vm3658_vm4, %v3501_v13  ;;  %vm3668_vm4 = vcmask 1043456  }
  0x6a   : > { %3653 = vst [vmem:[#allocation18_spill] sm:$0xff] %v2206_v34  ;;  %1354 = vmatpush.msk.msrb.mxu3 %vm3659_vm3, %v3501_v13  ;;  %vm3669_vm3 = vmmov %vm3668_vm4 }
  0x6b   : > { %1339 = vmatpush.msk.msrb.mxu2 %vm3660_vm5, %v3501_v13  ;;  %vm3670_vm5 = vnez %v3619_v51  ;;  %v3493_v51 = vmul.u32 64, %v1851_v20 }
  0x6c   : > { %1355 = vmatpush.msk.msrb.mxu3 %vm3661_vm10, %v3501_v13  ;;  %vm3671_vm10 = vnez %v3621_v53  ;;  %v3482_v53 = vmul.u32 64, %v1865_v23 }
  0x6d   : > { %1340 = vmatpush.msk.msrb.mxu2 %vm3662_vm12, %v3501_v13  ;;  %vm3672_vm12 = vmmov %vm3669_vm3 }
  0x6e   : > { %1356 = vmatpush.msk.msrb.mxu3 %vm3663_vm0, %v3501_v13  ;;  %1262 = vmatpush.msk.msra.mxu0 %vm3672_vm12, %v402_v38  ;;  %vm3673_vm0 = vnez %v3623_v54  ;;  %v2305_v54 = vadd.s32 1, %v1865_v23  ;;  %vm3686_vm12 = vnez %v3635_v3  ;;  %v2370_v3 = vadd.s32 1, %v1876_v26 }
  0x6f   : > { %1341 = vmatpush.msk.msrb.mxu2 %vm3664_vm6, %v3501_v13  ;;  %vm3674_vm6 = vnez %v3625_v57  ;;  %v3676_v57 = vmov 0  ;;  %v2407_v38 = vadd.s32 1, %v1917_v33 }
  0x70   : > { %1357 = vmatpush.msk.msrb.mxu3 %vm3665_vm7, %v3501_v13  ;;  %vm3675_vm7 = vnez %v3627_v59  ;;  %v3679_v59 = vmov 0  ;;  %v3481_v18 = vmul.u32 64, %v2305_v54 }
  0x71   : > { %1342 = vmatpush.msk.msrb.mxu2 %vm3666_vm11, %v3501_v13  ;;  %vm2313_vm11 = vcmp.ge.s32.totalorder %v1813_v5, %v765_v48 }
  0x72   : > { %1358 = vmatpush.msk.msrb.mxu3 %vm3667_vm15, %v3501_v13  ;;  %v3677_v57 = vsel %vm2313_vm11, 4294967295, %v3676_v57  ;;  %vm3678_vm15 = vnez %v3630_v61 }
  0x73   : > { %1343 = vmatpush.msk.msrb.mxu2 %vm3670_vm5, %v3501_v13  ;;  %vm3683_vm5 = vnez %v3632_v63  ;;  %v3687_v63 = vmov 0 }
  0x74   : > { %1359 = vmatpush.msk.msrb.mxu3 %vm3671_vm10, %v3501_v13  ;;  %vm2343_vm10 = vcmp.lt.s32.totalorder %v1813_v5, %v829_v0 }
  0x75   : > { %1344 = vmatpush.msk.msrb.mxu2 %vm3673_vm0, %v3501_v13  ;;  %vm3467_vm0 = vmand %vm2313_vm11, %vm2343_vm10 }
  0x76   : > { %1360 = vmatpush.msk.msrb.mxu3 %vm3674_vm6, %v3501_v13  ;;  %vm2358_vm6 = vcmp.lt.s32.totalorder %v1813_v5, %v3486_v9  ;;  %1304 = vmatpush.msk.msrb.mxu0 %vm3467_vm0, %v3501_v13  ;;  %v2583_v9 = vadd.s32 128, %v1813_v5 }
  0x77   : > { %1345 = vmatpush.msk.msrb.mxu2 %vm3675_vm7, %v3501_v13  ;;  %v3688_v63 = vsel %vm2358_vm6, 4294967295, %v3687_v63  ;;  %vm2365_vm7 = vcmp.lt.s32.totalorder %v1813_v5, %v3481_v18  ;;  %v3497_v18 = vmul.u32 64, %v2023_v50 }
  0x78   : > { %1361 = vmatpush.msk.msrb.mxu3 %vm3678_vm15, %v3501_v13  ;;  %vm3691_vm15 = vnez %v3637_v4  ;;  %v3693_v4 = vmov 0 }
  0x79   : > { %1346 = vmatpush.msk.msrb.mxu2 %vm3683_vm5, %v3501_v13 }
  0x7a   : > { %1362 = vmatpush.msk.msrb.mxu3 %vm3686_vm12, %v3501_v13  ;;  %vm3692_vm12 = vnez %v3640_v10 }
  0x7b   : > { %1347 = vmatpush.msk.msrb.mxu2 %vm3691_vm15, %v3501_v13  ;;  %vm2421_vm15 = vcmp.ge.s32.totalorder %v1813_v5, %v3474_v12 }
  0x7c   : > { %1363 = vmatpush.msk.msrb.mxu3 %vm3692_vm12, %v3501_v13  ;;  %vm3695_vm12 = vnez %v3642_v15  ;;  %v3698_v15 = vmov 0 }
  0x7d   : > { %1348 = vmatpush.msk.msrb.mxu2 %vm3695_vm12, %v3501_v13 }
  0x7e   : > { %1364 = vmatpush.msk.msrb.mxu3 %vm2162_vm14, %v3501_v13 }
  0x80   : > { %1365 = vmatpush.msk.msrb.mxu3 %vm2182_vm9, %v3501_v13 }
  0x82   : > { %1366 = vmatpush.msk.msrb.mxu3 %vm2202_vm13, %v3501_v13 }
  0x84   : > { %1367 = vmatpush.msk.msrb.mxu3 %vm2218_vm2, %v3501_v13 }
  0xae   : > { %v552_v11 = vpop.permute.xlu0 %551 }
  0xaf   : > { %v556_v42 = vperm.slane %v552_v11, %v2206_v34  ;;  %v3684_v11 = vmov 0 }
  0xb0   : > { %v3685_v11 = vsel %vm2343_vm10, 4294967295, %v3684_v11 }
  0xb1   : > { %v558_v44 = vmul.f32 %v556_v42, %v1810_v2  ;;  %v3477_v42 = vmul.u32 64, %v1876_v26  ;;  %v3745_v2 = vmov 1.0  }
  0xb3   : > { %560 = vst [vmem:[#allocation1] ss:$2 sm:$0xff] %v558_v44  ;;  %v3689_v44 = vmov 0  ;;  %vm2400_vm0 = vcmp.ge.s32.totalorder %v1813_v5, %v3477_v42  ;;  %v3491_v42 = vmul.u32 64, %v1988_v46 }
  0xb4   : > { %v3690_v44 = vsel %vm2365_vm7, 4294967295, %v3689_v44  ;;  %v3694_v4 = vsel %vm2400_vm0, 4294967295, %v3693_v4 }
  0xba   : > { %v561_v22 = vld.sshfl [vmem:[#allocation1] sm:$0xff pattern:$0x75316420]  ;;  %v562_v25 = vld.sshfl [vmem:[#allocation1 + $0x8] sm:$0xff pattern:$0x75316420] }
  0xbb   : > { %v565_v28 = vsel %vm3668_vm4, %v561_v22, 0.0  ;;  %v572_v29 = vsel %vm3669_vm3, %v562_v25, 0.0  ;;  %vm2324_vm4 = vcmp.ge.s32.totalorder %v1813_v5, %v3493_v51  ;;  %vm2332_vm3 = vcmp.ge.s32.totalorder %v1813_v5, %v3482_v53 }
  0xbc   : > { %v566_v32 = vrot.slane %v565_v28, 4  ;;  %v573_v37 = vrot.slane %v572_v29, 4  ;;  %v3680_v59 = vsel %vm2324_vm4, 4294967295, %v3679_v59  ;;  %v3682_v16 = vsel %vm2332_vm3, 4294967295, %v3681_v16  ;;  %vm3468_vm5 = vmand %vm2324_vm4, %vm2358_vm6 }
  0xbd   : > { %1305 = vmatpush.msk.msrb.mxu0 %vm3468_vm5, %v3501_v13  ;;  %vm3700_vm5 = vnez %v3646_v21  ;;  %vm3701_vm14 = vmand %vm2332_vm3, %vm2365_vm7  ;;  %v3702_v21 = vmov 0  ;;  %v2561_v53 = vadd.s32 1, %v2023_v50  ;;  %v3730_v51 = vmov 0 }
  0xbe   : > { %v567_v45 = vadd.f32 %v566_v32, %v565_v28  ;;  %v574_v47 = vadd.f32 %v573_v37, %v572_v29  ;;  %v396_v28 = vsub.f32 1.0, %v2286_v40  ;;  %v2388_v29 = vadd.s32 1, %v1906_v30  ;;  %1349 = vmatpush.msk.msrb.mxu2 %vm3700_vm5, %v3501_v13 }
  0xbf   : > { %v3476_v32 = vmul.u32 64, %v2370_v3  ;;  %v3472_v37 = vmul.u32 64, %v1917_v33  ;;  %1306 = vmatpush.msk.msrb.mxu0 %vm3701_vm14, %v3501_v13  ;;  %v3499_v8 = vmul.u32 64, %v2561_v53  ;;  %v2606_v40 = vadd.s32 1, %v2056_v55 }
  0xc0   : > { %v568_v56 = vrot.slane %v567_v45, 2  ;;  %v575_v60 = vrot.slane %v574_v47, 2  ;;  %1350 = vmatpush.msk.msrb.mxu2 %vm2193_vm8, %v3501_v13  ;;  %vm2646_vm7 = vcmp.ge.s32.totalorder %v1813_v5, %v3497_v18  ;;  %v3737_v18 = vmul.u32 64, %v1851_v20 }
  0xc1   : > { %vm2432_vm12 = vcmp.lt.s32.totalorder %v1813_v5, %v3476_v32  ;;  %vm2464_vm5 = vcmp.ge.s32.totalorder %v1813_v5, %v3472_v37  ;;  %v435_v37 = vld [vmem:[%s3437_s3] sm:$0x1]  ;;  %v3734_v7 = vsel %vm2646_vm7, 4294967295, %v3733_v7  ;;  %vm2653_vm3 = vcmp.lt.s32.totalorder %v1813_v5, %v3499_v8 }
  0xc2   : > { %v569_v61 = vadd.f32 %v568_v56, %v567_v45  ;;  %v576_v19 = vadd.f32 %v575_v60, %v574_v47  ;;  %v3696_v47 = vmov 0  ;;  %v3471_v56 = vmul.u32 64, %v2388_v29  ;;  %vm3475_vm6 = vmand %vm2400_vm0, %vm2432_vm12  ;;  %1351 = vmatpush.msk.msrb.mxu2 %vm2211_vm1, %v3501_v13 }
  0xc3   : > { %v3697_v47 = vsel %vm2421_vm15, 4294967295, %v3696_v47  ;;  %v3699_v15 = vsel %vm2432_vm12, 4294967295, %v3698_v15  ;;  %v3473_v60 = vmul.u32 64, %v2407_v38  ;;  %1307 = vmatpush.msk.msrb.mxu0 %vm3475_vm6, %v3501_v13  ;;  %vm441_vm12 = vcmask 1040384  }
  0xc4   : > { %v570_v22 = vrot.slane %v569_v61, 1  ;;  %v577_v25 = vrot.slane %v576_v19, 1  ;;  %vm2457_vm4 = vcmp.lt.s32.totalorder %v1813_v5, %v3471_v56  ;;  %v2478_v56 = vadd.s32 1, %v1971_v41  ;;  %1264 = vmatpush.msk.msra.mxu1 %vm441_vm12, %v435_v37 }
  0xc5   : > { %v3703_v21 = vsel %vm2457_vm4, 4294967295, %v3702_v21  ;;  %vm2471_vm14 = vcmp.lt.s32.totalorder %v1813_v5, %v3473_v60  ;;  %vm3714_vm13 = vmand %vm2421_vm15, %vm2457_vm4  ;;  %vm2570_vm4 = vcmp.ge.s32.totalorder %v1813_v5, %v3487_v27  ;;  %v3721_v37 = vmov 0 }
  0xc6   : > { %v571_v10 = vadd.f32 %v570_v22, %v569_v61  ;;  %v578_v45 = vadd.f32 %v577_v25, %v576_v19  ;;  %v3479_v61 = vmul.u32 64, %v1921_v35  ;;  %v2439_v19 = vadd.s32 1, %v1921_v35  ;;  %1308 = vmatpush.msk.msrb.mxu0 %vm3714_vm13, %v3501_v13  ;;  %vm3723_vm13 = vmand %vm2464_vm5, %vm2471_vm14 }
  0xc7   : > { %v3706_v25 = vmov 0  ;;  %v3485_v32 = vmul.u32 64, %v2478_v56  ;;  %v397_v27 = vmul.f32 %v2268_v14, %v396_v28  ;;  %vm2600_vm15 = vcmp.ge.s32.totalorder %v1813_v5, %v3491_v42 }
  0xc8   : > { %v581_v17 = vadd.f32 %v580_v39, %v571_v10  ;;  %v582_v22 = vadd.f32 %v580_v39, %v578_v45  ;;  %v3704_v39 = vmov 0  ;;  %v3707_v25 = vsel %vm2471_vm14, 4294967295, %v3706_v25  ;;  %1309 = vmatpush.msk.msrb.mxu0 %vm3723_vm13, %v3501_v13 }
  0xc9   : > { %v3705_v39 = vsel %vm2464_vm5, 4294967295, %v3704_v39  ;;  %v3478_v10 = vmul.u32 64, %v2439_v19  ;;  %v3484_v45 = vmul.u32 64, %v1971_v41  ;;  %vm2510_vm9 = vcmp.ge.s32.totalorder %v1813_v5, %v3479_v61 }
  0xca   : > { %v2489_v60 = vmul.f32 0.1, %v581_v17  ;;  %v2491_v12 = vmul.f32 0.1, %v582_v22  ;;  %v3710_v17 = vmov 0  ;;  %v3712_v22 = vmov 0 }
  0xcb   : > { %v3711_v17 = vsel %vm2510_vm9, 4294967295, %v3710_v17  ;;  %vm2517_vm6 = vcmp.lt.s32.totalorder %v1813_v5, %v3478_v10  ;;  %v3489_v10 = vmul.u32 64, %v2505_v24  ;;  %v2537_v61 = vadd.s32 1, %v1988_v46 }
  0xcc   : > { %3708 = vst [vmem:[#allocation19_spill] sm:$0xff] %v2489_v60  ;;  %v3713_v22 = vsel %vm2517_vm6, 4294967295, %v3712_v22  ;;  %942 = vmatmul.f32.vlgmr.msra.gmra.mxu2 %v2489_v60  ;;  %962 = vmatmul.f32.vlgmr.msra.gmra.mxu3 %v2491_v12  ;;  %vm2548_vm1 = vcmp.ge.s32.totalorder %v1813_v5, %v3484_v45  ;;  %vm2555_vm8 = vcmp.lt.s32.totalorder %v1813_v5, %v3485_v32  ;;  %v3726_v28 = vmov 0  ;;  %vm3732_vm2 = vmand %vm2510_vm9, %vm2517_vm6  ;;  %v403_v45 = vld [vmem:[#allocation2] sm:$0x1] }
  0xcd   : > { %3709 = vst [vmem:[#allocation20_spill] sm:$0xff] %v2491_v12  ;;  %v3716_v31 = vsel %vm2548_vm1, 4294967295, %v3715_v31  ;;  %v3718_v36 = vsel %vm2555_vm8, 4294967295, %v3717_v36  ;;  %vm2577_vm12 = vcmp.lt.s32.totalorder %v1813_v5, %v3489_v10  ;;  %v3498_v32 = vmul.u32 64, %v2537_v61  ;;  %1310 = vmatpush.msk.msrb.mxu0 %vm3732_vm2, %v3501_v13  ;;  %vm3746_vm2 = vmand %vm2548_vm1, %vm2555_vm8 }
  0xce   : > { %v3722_v37 = vsel %vm2577_vm12, 4294967295, %v3721_v37  ;;  %vm2622_vm14 = vcmp.ge.s32.totalorder %v2583_v9, %v765_v48  ;;  %v3728_v42 = vmov 0  ;;  %vm2629_vm5 = vcmp.lt.s32.totalorder %v2583_v9, %v829_v0  ;;  %vm3756_vm1 = vmand %vm2570_vm4, %vm2577_vm12 }
  0xcf   : > { %vm2615_vm13 = vcmp.lt.s32.totalorder %v1813_v5, %v3498_v32  ;;  %v3729_v42 = vsel %vm2622_vm14, 4294967295, %v3728_v42  ;;  %v3731_v51 = vsel %vm2629_vm5, 4294967295, %v3730_v51  ;;  %v3735_v48 = vmov 0  ;;  %1311 = vmatpush.msk.msrb.mxu0 %vm3746_vm2, %v3745_v2  ;;  %vm3755_vm8 = vmand %vm2622_vm14, %vm2629_vm5 }
  0xd0   : > { %v3727_v28 = vsel %vm2615_vm13, 4294967295, %v3726_v28  ;;  %v3736_v48 = vsel %vm2653_vm3, 4294967295, %v3735_v48  ;;  %vm2666_vm0 = vcmp.ge.s32.totalorder %v2583_v9, %v3737_v18  ;;  %v3738_v32 = vmov 0  ;;  %1320 = vmatpush.msk.msrb.mxu1 %vm3755_vm8, %v3745_v2  ;;  %vm3763_vm14 = vmand %vm2600_vm15, %vm2615_vm13 }
  0xd1   : > { %v3739_v32 = vsel %vm2666_vm0, 4294967295, %v3738_v32  ;;  %v3741_v8 = vmul.u32 64, %v2301_v52  ;;  %v3742_v13 = vmov 0  ;;  %v2678_v0 = vadd.s32 1, %v2071_v58  ;;  %1312 = vmatpush.msk.msrb.mxu0 %vm3756_vm1, %v3745_v2 }
  0xd2   : > { %3740 = vst [vmem:[#allocation21_spill] sm:$0xff] %v3739_v32  ;;  %v398_v49 = vadd.f32 %v2268_v14, %v397_v27  ;;  %v3747_v52 = vmul.u32 64, %v1865_v23  ;;  %v3748_v18 = vmov 0  ;;  %v3751_v27 = vmul.u32 64, %v2305_v54 }
  0xd3   : > { %vm2673_vm6 = vcmp.lt.s32.totalorder %v2583_v9, %v3741_v8  ;;  %v3752_v8 = vmov 0  ;;  %vm399_vm2 = vweird.f32 %v2268_v14  ;;  %v3757_v54 = vmul.u32 64, %v2056_v55  ;;  %1313 = vmatpush.msk.msrb.mxu0 %vm3763_vm14, %v3745_v2  ;;  %vm3770_vm14 = vmand %vm2646_vm7, %vm2653_vm3 }
  0xd4   : > { %v3743_v13 = vsel %vm2673_vm6, 4294967295, %v3742_v13  ;;  %vm2695_vm10 = vcmp.ge.s32.totalorder %v2583_v9, %v3747_v52  ;;  %vm2702_vm11 = vcmp.lt.s32.totalorder %v2583_v9, %v3751_v27  ;;  %v3758_v52 = vmov 0  ;;  %vm3515_vm5 = vmand %vm2666_vm0, %vm2673_vm6 }
  0xd5   : > { %3744 = vst [vmem:[#allocation22_spill] sm:$0xff] %v3743_v13  ;;  %v3749_v18 = vsel %vm2695_vm10, 4294967295, %v3748_v18  ;;  %v3753_v8 = vsel %vm2702_vm11, 4294967295, %v3752_v8  ;;  %vm2727_vm9 = vcmp.ge.s32.totalorder %v1813_v5, %v3757_v54  ;;  %v3760_v27 = vmul.u32 64, %v2606_v40  ;;  %1321 = vmatpush.msk.msrb.mxu1 %vm3515_vm5, %v3745_v2  ;;  %vm3518_vm1 = vmand %vm2695_vm10, %vm2702_vm11  ;;  %1314 = vmatpush.msk.msrb.mxu0 %vm3770_vm14, %v3745_v2 }
  0xd6   : > { %3750 = vst [vmem:[#allocation23_spill] sm:$0xff] %v3749_v18  ;;  %v3759_v52 = vsel %vm2727_vm9, 4294967295, %v3758_v52  ;;  %v3761_v20 = vmov 0  ;;  %v400_v54 = vsel %vm399_vm2, %v2268_v14, %v398_v49  ;;  %v3765_v23 = vmov 0 }
  0xd7   : > { %3754 = vst [vmem:[#allocation24_spill] sm:$0xff] %v3753_v8  ;;  %vm2734_vm8 = vcmp.lt.s32.totalorder %v1813_v5, %v3760_v27  ;;  %v3764_v27 = vmul.u32 64, %v2071_v58  ;;  %v3767_v34 = vmul.u32 64, %v2678_v0  ;;  %v3768_v12 = vmov 0  ;;  %1322 = vmatpush.msk.msrb.mxu1 %vm3518_vm1, %v3745_v2 }
  0xd8   : > { %v3762_v20 = vsel %vm2734_vm8, 4294967295, %v3761_v20  ;;  %vm408_vm6 = vcmask 31744   ;;  %vm3771_vm1 = vmand %vm2727_vm9, %vm2734_vm8  ;;  %v2812_v60 = vadd.s32 1, %v2110_v1  ;;  %v3776_v8 = vmul.u32 64, %v1876_v26 }
  0xd9   : > { %vm2762_vm12 = vcmp.ge.s32.totalorder %v1813_v5, %v3764_v27  ;;  %vm2769_vm5 = vcmp.lt.s32.totalorder %v1813_v5, %v3767_v34  ;;  %v393_v14 = vpop.xlane.xlu0 %392  ;;  %1315 = vmatpush.msk.msrb.mxu0 %vm3771_vm1, %v3745_v2  ;;  %v3524_v27 = vmul.u32 64, %v2097_v62  ;;  %v3777_v18 = vmov 0 }
  0xda   : > { %v3766_v23 = vsel %vm2762_vm12, 4294967295, %v3765_v23  ;;  %v3769_v12 = vsel %vm2769_vm5, 4294967295, %v3768_v12  ;;  %v401_v34 = vmul.f32 %v400_v54, %v393_v14  ;;  %vm3523_vm2 = vmand %vm2762_vm12, %vm2769_vm5  ;;  %v2807_v54 = vadd.s32 1, %v2097_v62 }
  0xdb   : > { %1316 = vmatpush.msk.msrb.mxu0 %vm3523_vm2, %v3745_v2  ;;  %vm2817_vm1 = vcmp.ge.s32.totalorder %v1813_v5, %v3524_v27  ;;  %vm2831_vm14 = vcmp.ge.s32.totalorder %v2583_v9, %v3776_v8  ;;  %v3780_v13 = vmul.u32 64, %v2370_v3  ;;  %v3781_v27 = vmov 0 }
  0xdc   : > { %v407_v49 = vperm.slane %v401_v34, %v1813_v5  ;;  %v3526_v14 = vmul.u32 64, %v2807_v54  ;;  %v3772_v34 = vmov 0  ;;  %v3778_v18 = vsel %vm2831_vm14, 4294967295, %v3777_v18 }
  0xdd   : > { %v3773_v34 = vsel %vm2817_vm1, 4294967295, %v3772_v34  ;;  %3779 = vst [vmem:[#allocation25_spill] sm:$0xff] %v3778_v18  ;;  %vm2838_vm2 = vcmp.lt.s32.totalorder %v2583_v9, %v3780_v13  ;;  %v815_v26 = vmul.u32 64, %v2812_v60  ;;  %v2849_v8 = vadd.s32 1, %v1815_v6 }
  0xde   : > { %1263 = vmatmul.msk.f32.vlgmr.msra.gmra.mxu0 %vm408_vm6, %v407_v49  ;;  %vm2824_vm6 = vcmp.lt.s32.totalorder %v1813_v5, %v3526_v14  ;;  %v3774_v49 = vmov 0  ;;  %v3782_v27 = vsel %vm2838_vm2, 4294967295, %v3781_v27  ;;  %v751_v14 = vmul.u32 64, %v2110_v1  ;;  %vm3534_vm10 = vmand %vm2831_vm14, %vm2838_vm2 }
  0xdf   : > { %v3775_v49 = vsel %vm2824_vm6, 4294967295, %v3774_v49  ;;  %3783 = vst [vmem:[#allocation26_spill] sm:$0xff] %v3782_v27  ;;  %vm3531_vm11 = vmand %vm2817_vm1, %vm2824_vm6  ;;  %v3784_v13 = vmul.u32 64, %v1906_v30  ;;  %v3785_v1 = vmov 0  ;;  %v3787_v3 = vmul.u32 64, %v2388_v29  ;;  %1323 = vmatpush.msk.msrb.mxu1 %vm3534_vm10, %v3745_v2 }
  0xe0   : > { %1317 = vmatpush.msk.msrb.mxu0 %vm3531_vm11, %v3745_v2  ;;  %v3788_v60 = vmov 0  ;;  %v750_v32 = vmul.u32 64, %v1815_v6  ;;  %vm2883_vm11 = vcmp.ge.s32.totalorder %v1813_v5, %v751_v14  ;;  %v3790_v30 = vmov 0 }
  0xe1   : > { %vm2864_vm0 = vcmp.ge.s32.totalorder %v2583_v9, %v3784_v13  ;;  %vm2871_vm5 = vcmp.lt.s32.totalorder %v2583_v9, %v3787_v3  ;;  %v3791_v30 = vsel %vm2883_vm11, 4294967295, %v3790_v30  ;;  %vm2888_vm6 = vcmp.lt.s32.totalorder %v1813_v5, %v815_v26 }
  0xe2   : > { %v3786_v1 = vsel %vm2864_vm0, 4294967295, %v3785_v1  ;;  %v3789_v60 = vsel %vm2871_vm5, 4294967295, %v3788_v60  ;;  %v3792_v29 = vmov 0  ;;  %v814_v13 = vmul.u32 64, %v2849_v8  ;;  %vm3544_vm10 = vmand %vm2883_vm11, %vm2888_vm6 }
  0xe3   : > { %v3793_v29 = vsel %vm2888_vm6, 4294967295, %v3792_v29  ;;  %vm2902_vm2 = vcmp.ge.s32.totalorder %v1813_v5, %v750_v32  ;;  %v3794_v3 = vmov 0  ;;  %v3796_v6 = vmul.u32 64, %v1917_v33  ;;  %1318 = vmatpush.msk.msrb.mxu0 %vm3544_vm10, %v3745_v2  ;;  %vm3804_vm12 = vmand %vm2864_vm0, %vm2871_vm5 }
  0xe4   : > { %v3795_v3 = vsel %vm2902_vm2, 4294967295, %v3794_v3  ;;  %v3797_v27 = vmov 0  ;;  %v3800_v18 = vmul.u32 64, %v2407_v38  ;;  %v3801_v8 = vmov 0  ;;  %1324 = vmatpush.msk.msrb.mxu1 %vm3804_vm12, %v3745_v2 }
  0xe5   : > { %vm2909_vm14 = vcmp.ge.s32.totalorder %v2583_v9, %v3796_v6  ;;  %vm2933_vm8 = vcmp.lt.s32.totalorder %v1813_v5, %v814_v13  ;;  %v3805_v6 = vmov 0  ;;  %v3807_v33 = vmul.u32 64, %v1921_v35 }
  0xe6   : > { %v3798_v27 = vsel %vm2909_vm14, 4294967295, %v3797_v27  ;;  %vm2916_vm1 = vcmp.lt.s32.totalorder %v2583_v9, %v3800_v18  ;;  %v3806_v6 = vsel %vm2933_vm8, 4294967295, %v3805_v6  ;;  %vm3548_vm10 = vmand %vm2902_vm2, %vm2933_vm8  ;;  %v3810_v5 = vmul.u32 64, %v2439_v19 }
  0xe7   : > { %3799 = vst [vmem:[#allocation27_spill] sm:$0xff] %v3798_v27  ;;  %v3802_v8 = vsel %vm2916_vm1, 4294967295, %v3801_v8  ;;  %vm3550_vm9 = vmand %vm2909_vm14, %vm2916_vm1  ;;  %vm2948_vm5 = vcmp.ge.s32.totalorder %v2583_v9, %v3807_v33  ;;  %v3811_v18 = vmov 0  ;;  %1319 = vmatpush.msk.msrb.mxu0 %vm3548_vm10, %v3745_v2  ;;  %v3813_v35 = vmul.u32 64, %v1971_v41 }
  0xe8   : > { %3803 = vst [vmem:[#allocation28_spill] sm:$0xff] %v3802_v8  ;;  %vm2955_vm12 = vcmp.lt.s32.totalorder %v2583_v9, %v3810_v5  ;;  %1325 = vmatpush.msk.msrb.mxu1 %vm3550_vm9, %v3745_v2  ;;  %v3814_v19 = vmov 0  ;;  %v3816_v33 = vmul.u32 64, %v2478_v56  ;;  %v3817_v5 = vmov 0 }
  0xe9   : > { %v3812_v18 = vsel %vm2955_vm12, 4294967295, %v3811_v18  ;;  %vm2978_vm6 = vcmp.ge.s32.totalorder %v2583_v9, %v3813_v35  ;;  %v3819_v8 = vmul.u32 64, %v1975_v43  ;;  %v3820_v27 = vmov 0  ;;  %vm3828_vm0 = vmand %vm2948_vm5, %vm2955_vm12 }
  0xea   : > { %v3815_v19 = vsel %vm2978_vm6, 4294967295, %v3814_v19  ;;  %vm2985_vm10 = vcmp.lt.s32.totalorder %v2583_v9, %v3816_v33  ;;  %v3822_v41 = vmul.u32 64, %v2505_v24  ;;  %v3823_v56 = vmov 0  ;;  %1326 = vmatpush.msk.msrb.mxu1 %vm3828_vm0, %v3745_v2 }
  0xeb   : > { %v3818_v5 = vsel %vm2985_vm10, 4294967295, %v3817_v5  ;;  %vm2992_vm9 = vcmp.ge.s32.totalorder %v2583_v9, %v3819_v8  ;;  %vm3825_vm14 = vnez %v3677_v57  ;;  %vm3826_vm8 = vnez %v3685_v11 }
  0xec   : > { %v3821_v27 = vsel %vm2992_vm9, 4294967295, %v3820_v27  ;;  %vm3003_vm1 = vcmp.lt.s32.totalorder %v2583_v9, %v3822_v41  ;;  %vm3827_vm2 = vmand %vm3825_vm14, %vm3826_vm8  ;;  %vm3829_vm3 = vnez %v3680_v59  ;;  %vm3830_vm7 = vnez %v3688_v63 }
  0xed   : > { %v3824_v56 = vsel %vm3003_vm1, 4294967295, %v3823_v56  ;;  %1368 = vmatpush.msk.msra.mxu0 %vm3827_vm2, %v3745_v2  ;;  %vm3560_vm11 = vmand %vm2992_vm9, %vm3003_vm1  ;;  %v3833_v43 = vmul.u32 64, %v1988_v46  ;;  %v3834_v57 = vmov 0  ;;  %v3836_v59 = vmul.u32 64, %v2537_v61 }
  0xee   : > { %vm3831_vm13 = vmand %vm3829_vm3, %vm3830_vm7  ;;  %v3837_v11 = vmov 0  ;;  %vm3839_vm3 = vnez %v3682_v16  ;;  %vm3840_vm7 = vnez %v3690_v44  ;;  %v3842_v46 = vmul.u32 64, %v2023_v50 }
  0xef   : > { %1369 = vmatpush.msk.msra.mxu0 %vm3831_vm13, %v3745_v2  ;;  %vm3832_vm8 = vmand %vm2978_vm6, %vm2985_vm10  ;;  %vm3038_vm0 = vcmp.ge.s32.totalorder %v2583_v9, %v3833_v43  ;;  %vm3045_vm2 = vcmp.lt.s32.totalorder %v2583_v9, %v3836_v59  ;;  %v3843_v16 = vmov 0  ;;  %v3845_v63 = vmul.u32 64, %v2561_v53 }
  0xf0   : > { %1327 = vmatpush.msk.msrb.mxu1 %vm3832_vm8, %v3745_v2  ;;  %v3835_v57 = vsel %vm3038_vm0, 4294967295, %v3834_v57  ;;  %v3838_v11 = vsel %vm3045_vm2, 4294967295, %v3837_v11  ;;  %vm3841_vm13 = vmand %vm3839_vm3, %vm3840_vm7  ;;  %vm3068_vm8 = vcmp.ge.s32.totalorder %v2583_v9, %v3842_v46  ;;  %v3846_v44 = vmov 0 }
  0xf1   : > { %1370 = vmatpush.msk.msra.mxu0 %vm3841_vm13, %v3745_v2  ;;  %vm3563_vm14 = vmand %vm3038_vm0, %vm3045_vm2  ;;  %v3844_v16 = vsel %vm3068_vm8, 4294967295, %v3843_v16  ;;  %vm3075_vm3 = vcmp.lt.s32.totalorder %v2583_v9, %v3845_v63  ;;  %vm3848_vm7 = vnez %v3694_v4  ;;  %vm3849_vm13 = vnez %v3699_v15 }
  0xf2   : > { %1328 = vmatpush.msk.msrb.mxu1 %vm3560_vm11, %v3745_v2  ;;  %v3847_v44 = vsel %vm3075_vm3, 4294967295, %v3846_v44  ;;  %vm3850_vm11 = vmand %vm3848_vm7, %vm3849_vm13  ;;  %v3851_v50 = vmul.u32 64, %v2056_v55  ;;  %v3852_v53 = vmov 0  ;;  %v3854_v4 = vmul.u32 64, %v2606_v40 }
  0xf3   : > { %1371 = vmatpush.msk.msra.mxu0 %vm3850_vm11, %v3745_v2  ;;  %vm3566_vm1 = vmand %vm3068_vm8, %vm3075_vm3  ;;  %v3855_v15 = vmov 0  ;;  %vm3857_vm7 = vnez %v3697_v47  ;;  %vm3858_vm13 = vnez %v3703_v21  ;;  %v3860_v55 = vmul.u32 64, %v2071_v58 }
  0xf4   : > { %1329 = vmatpush.msk.msrb.mxu1 %vm3563_vm14, %v3745_v2  ;;  %vm3098_vm9 = vcmp.ge.s32.totalorder %v2583_v9, %v3851_v50  ;;  %vm3105_vm11 = vcmp.lt.s32.totalorder %v2583_v9, %v3854_v4  ;;  %vm3859_vm14 = vmand %vm3857_vm7, %vm3858_vm13  ;;  %v3861_v47 = vmov 0  ;;  %v3863_v61 = vmul.u32 64, %v2678_v0 }
  0xf5   : > { %v3853_v53 = vsel %vm3098_vm9, 4294967295, %v3852_v53  ;;  %v3856_v15 = vsel %vm3105_vm11, 4294967295, %v3855_v15  ;;  %1372 = vmatpush.msk.msra.mxu0 %vm3859_vm14, %v3745_v2  ;;  %vm3569_vm2 = vmand %vm3098_vm9, %vm3105_vm11  ;;  %vm3128_vm0 = vcmp.ge.s32.totalorder %v2583_v9, %v3860_v55  ;;  %v3864_v21 = vmov 0 }
  0xf6   : > { %1330 = vmatpush.msk.msrb.mxu1 %vm3566_vm1, %v3745_v2  ;;  %v3862_v47 = vsel %vm3128_vm0, 4294967295, %v3861_v47  ;;  %vm3135_vm14 = vcmp.lt.s32.totalorder %v2583_v9, %v3863_v61  ;;  %vm3866_vm7 = vnez %v3705_v39  ;;  %vm3867_vm13 = vnez %v3707_v25 }
  0xf7   : > { %v3865_v21 = vsel %vm3135_vm14, 4294967295, %v3864_v21  ;;  %vm3868_vm1 = vmand %vm3866_vm7, %vm3867_vm13  ;;  %v3869_v58 = vmul.u32 64, %v2097_v62  ;;  %v3872_v25 = vmul.u32 64, %v2807_v54  ;;  %vm3170_vm7 = vcmp.ge.s32.totalorder %v2583_v9, %v751_v14 }
  0xf8   : > { %1373 = vmatpush.msk.msra.mxu0 %vm3868_vm1, %v3745_v2  ;;  %1331 = vmatpush.msk.msrb.mxu1 %vm3569_vm2, %v3745_v2  ;;  %vm3175_vm13 = vcmp.lt.s32.totalorder %v2583_v9, %v815_v26  ;;  %vm3879_vm3 = vnez %v3711_v17  ;;  %vm3880_vm11 = vnez %v3713_v22  ;;  %vm3882_vm10 = vmand %vm3128_vm0, %vm3135_vm14  ;;  %vm3196_vm6 = vcmp.ge.s32.totalorder %v2583_v9, %v750_v32 }
  0xf9   : > { %vm3158_vm8 = vcmp.ge.s32.totalorder %v2583_v9, %v3869_v58  ;;  %vm3165_vm1 = vcmp.lt.s32.totalorder %v2583_v9, %v3872_v25  ;;  %vm3881_vm9 = vmand %vm3879_vm3, %vm3880_vm11  ;;  %vm3201_vm2 = vcmp.lt.s32.totalorder %v2583_v9, %v814_v13  ;;  %v3885_v54 = vmov 0 }
  0xfa   : > { %1374 = vmatpush.msk.msra.mxu0 %vm3881_vm9, %v3745_v2  ;;  %1332 = vmatpush.msk.msrb.mxu1 %vm3882_vm10, %v3745_v2  ;;  %v3886_v54 = vsel %vm3201_vm2, 4294967295, %v3885_v54  ;;  %vm3887_vm3 = vnez %v3716_v31  ;;  %vm3888_vm10 = vnez %v3718_v36  ;;  %vm3890_vm14 = vmand %vm3158_vm8, %vm3165_vm1  ;;  %vm3891_vm9 = vnez %v3722_v37  ;;  %v3917_v36 = vld [vmem:[#allocation21_spill] sm:$0xff]  ;;  %v3919_v37 = vld [vmem:[#allocation22_spill] sm:$0xff] }
  0xfb   : > { %vm3889_vm11 = vmand %vm3887_vm3, %vm3888_vm10  ;;  %v488_v13 = vstv %s1266_s21  ;;  %v491_v38 = vstv %s1267_s19  ;;  %v508_v59 = vstv %s1268_s25  ;;  %v531_v50 = vstv %s1271_s17  ;;  %s1156_s21 = sshll.u32 %s1152_s6, 4  ;;  %s1157_s21 = int_to_ptr.hbm [resolvable:$true] %s1156_s21 }
  0xfc   : > { %1375 = vmatpush.msk.msra.mxu0 %vm3889_vm11, %v3745_v2  ;;  %1333 = vmatpush.msk.msrb.mxu1 %vm3890_vm14, %v3745_v2  ;;  %vm3577_vm0 = vmand %vm3196_vm6, %vm3201_vm2  ;;  %vm3894_vm14 = vnez %v3727_v28  ;;  %vm3899_vm11 = vnez %v3759_v52  ;;  %v3922_v28 = vld [vmem:[#allocation23_spill] sm:$0xff]  ;;  %s1569_s19 = sshra.s32 %s1157_s21, 4  ;;  %s1570_s19 = int_to_ptr.hbm [resolvable:$true] %s1569_s19 }
  0xfd   : > { %vm3892_vm12 = vmand %vm2570_vm4, %vm3891_vm9  ;;  %vm3896_vm4 = vnez %v3734_v7  ;;  %v3924_v7 = vld [vmem:[#allocation24_spill] sm:$0xff]  ;;  %v3964_v52 = vld [vmem:[#allocation19_spill] sm:$0xff]  ;;  %p1576_p9 = scmp.lt.s32.totalorder %s1570_s19, %s3443_s9 }
  0xfe   : > { %1376 = vmatpush.msk.msra.mxu0 %vm3892_vm12, %v3745_v2  ;;  %vm3893_vm3 = vmand %vm3170_vm7, %vm3175_vm13  ;;  %vm3897_vm12 = vnez %v3736_v48  ;;  %v3935_v48 = vld [vmem:[#allocation27_spill] sm:$0xff] }
  0xff   : > { %1334 = vmatpush.msk.msrb.mxu1 %vm3893_vm3, %v3745_v2  ;;  %vm3895_vm10 = vmand %vm2600_vm15, %vm3894_vm14  ;;  %vm3900_vm15 = vnez %v3762_v20  ;;  %vm3902_vm14 = vnez %v3766_v23  ;;  %v3937_v20 = vld [vmem:[#allocation28_spill] sm:$0xff] }
 0x100   : > { %1377 = vmatpush.msk.msra.mxu0 %vm3895_vm10, %v3745_v2  ;;  %vm3898_vm9 = vmand %vm3896_vm4, %vm3897_vm12  ;;  %vm3903_vm10 = vnez %v3769_v12  ;;  %vm3905_vm4 = vnez %v3773_v34  ;;  %vm3906_vm12 = vnez %v3775_v49  ;;  %v436_v34 = vld [vmem:[%s3438_s4] sm:$0x1] }
 0x101   : > { %1335 = vmatpush.msk.msrb.mxu1 %vm3577_vm0, %v3745_v2  ;;  %vm3901_vm3 = vmand %vm3899_vm11, %vm3900_vm15  ;;  %vm3908_vm11 = vnez %v3791_v30  ;;  %vm3909_vm15 = vnez %v3793_v29  ;;  %v3965_v30 = vld [vmem:[#allocation20_spill] sm:$0xff] }
 0x102   : > { %1378 = vmatpush.msk.msra.mxu0 %vm3898_vm9, %v3745_v2  ;;  %vm3904_vm0 = vmand %vm3902_vm14, %vm3903_vm10  ;;  %vm3912_vm14 = vnez %v3806_v6 }
 0x103   : > { %vm3907_vm9 = vmand %vm3905_vm4, %vm3906_vm12  ;;  %vm437_vm4 = vcmask 7168   ;;  %vm3914_vm12 = vnez %v3729_v42  ;;  %v3927_v42 = vld [vmem:[#allocation25_spill] sm:$0xff] }
 0x104   : > { %1379 = vmatpush.msk.msra.mxu0 %vm3901_vm3, %v3745_v2  ;;  %vm3910_vm3 = vmand %vm3908_vm11, %vm3909_vm15  ;;  %vm3918_vm15 = vnez %v3917_v36  ;;  %vm3928_vm2 = vnez %v3927_v42 }
 0x106   : > { %1380 = vmatpush.msk.msra.mxu0 %vm3904_vm0, %v3745_v2  ;;  %vm3911_vm0 = vnez %v3795_v3  ;;  %v468_v3 = vstv %s467_s23  ;;  %s1141_s23 = scalar_lea.sflag [#allocation6], %s1789_s12 }
 0x107   : > { %vm3913_vm10 = vmand %vm3911_vm0, %vm3912_vm14  ;;  %vm3923_vm14 = vnez %v3922_v28 }
 0x108   : > { %1381 = vmatpush.msk.msra.mxu0 %vm3907_vm9, %v3745_v2  ;;  %vm3915_vm9 = vnez %v3731_v51  ;;  %v3929_v51 = vld [vmem:[#allocation26_spill] sm:$0xff] }
 0x109   : > { %vm3916_vm11 = vmand %vm3914_vm12, %vm3915_vm9  ;;  %vm3930_vm12 = vnez %v3929_v51 }
 0x10a   : > { %1382 = vmatpush.msk.msra.mxu0 %vm3910_vm3, %v3745_v2  ;;  %vm3920_vm3 = vnez %v3919_v37  ;;  %vm3931_vm9 = vmand %vm3928_vm2, %vm3930_vm12  ;;  %vm3940_vm2 = vnez %v3812_v18  ;;  %vm3942_vm12 = vnez %v3815_v19  ;;  %v471_v18 = vstv %s470_s7  ;;  %s1571_s7 = scalar_lea.hbm %s1570_s19, 8 }
 0x10b   : > { %vm3921_vm0 = vmand %vm3918_vm15, %vm3920_vm3  ;;  %vm3933_vm15 = vnez %v3789_v60  ;;  %p1572_p1 = scmp.ne.s32.totalorder %s1570_s19, %s1571_s7  ;;  %p1577_p10 = scmp.lt.s32.totalorder %s1575_s24, %s1571_s7 }
 0x10c   : > { %1383 = vmatpush.msk.msra.mxu0 %vm3913_vm10, %v3745_v2  ;;  %vm3925_vm10 = vnez %v3924_v7 }
 0x10d   : > { %p1573_p4 = pnand %p1572_p1, %p1762_p5  ;;  %p1578_p2 = por %p1577_p10, %p1576_p9 }
 0x10f   : > { %p1574_p8 = pneg %p1573_p4 }
 0x111   : > { %p1579_p11 = pnand %p1578_p2, %p1574_p8 }
 0x14f   : > { %v943_v9 = vpop.f32.mrf.mxu2  ;;  %v963_v32 = vpop.f32.mrf.mxu3 }
 0x150   : > { %v964_v10 = vadd.f32 %v963_v32, %v943_v9 }
 0x152   : > { %v966_v12 = vmul.f32 0.015625, %v964_v10 }
 0x154   : > { %983 = vmatmul.f32.vlgmr.msrb.gmra.mxu0 %v966_v12 }
 0x15b   : > { %v431_v17 = vpop.f32.mrf.mxu0 }
 0x15c   : > { %v432_v22 = vadd.f32 %v431_v17, %v403_v45 }
 0x15e   : > { %v434_v31 = vmax.f32 %v432_v22, 0.0 }
 0x160   : > { %1265 = vmatmul.msk.f32.vlgmr.msra.gmra.mxu1 %vm437_vm4, %v434_v31  ;;  %vm3926_vm4 = vmand %vm3923_vm14, %vm3925_vm10  ;;  %vm3938_vm14 = vnez %v3937_v20 }
 0x161   : > { %1384 = vmatpush.msk.msra.mxu1 %vm3916_vm11, %v3745_v2  ;;  %vm3932_vm11 = vnez %v3786_v1 }
 0x162   : > { %vm3934_vm3 = vmand %vm3932_vm11, %vm3933_vm15  ;;  %vm3945_vm15 = vnez %v3821_v27 }
 0x163   : > { %1385 = vmatpush.msk.msra.mxu1 %vm3921_vm0, %v3745_v2  ;;  %vm3936_vm0 = vnez %v3935_v48 }
 0x164   : > { %vm3939_vm10 = vmand %vm3936_vm0, %vm3938_vm14  ;;  %vm3948_vm14 = vnez %v3835_v57  ;;  %v528_v57 = vstv %s1270_s22 }
 0x165   : > { %1386 = vmatpush.msk.msra.mxu1 %vm3926_vm4, %v3745_v2  ;;  %vm3941_vm4 = vmand %vm2948_vm5, %vm3940_vm2  ;;  %vm3949_vm5 = vnez %v3838_v11  ;;  %vm3951_vm2 = vnez %v3844_v16  ;;  %v3966_v11 = vld [vmem:[#allocation17_spill] sm:$0xff] }
 0x166   : > { %v536_v46 = vadd.s32 12, %v3966_v11  ;;  %v516_v16 = vadd.s32 4, %v3966_v11 }
 0x167   : > { %1387 = vmatpush.msk.msra.mxu1 %vm3931_vm9, %v3745_v2  ;;  %vm3943_vm9 = vnez %v3818_v5 }
 0x168   : > { %1003 = vmatmul.f32.vlgmr.msrb.gmra.mxu1 %v966_v12  ;;  %vm3944_vm11 = vmand %vm3942_vm12, %vm3943_vm9  ;;  %vm3954_vm9 = vnez %v3853_v53  ;;  %v511_v53 = vstv %s1269_s27 }
 0x169   : > { %1388 = vmatpush.msk.msra.mxu1 %vm3934_vm3, %v3745_v2  ;;  %vm3946_vm3 = vnez %v3824_v56 }
 0x16a   : > { %vm3947_vm0 = vmand %vm3945_vm15, %vm3946_vm3  ;;  %vm3957_vm3 = vnez %v3862_v47 }
 0x16b   : > { %1389 = vmatpush.msk.msra.mxu1 %vm3939_vm10, %v3745_v2  ;;  %vm3950_vm10 = vmand %vm3948_vm14, %vm3949_vm5 }
 0x16c   : > { %vm3960_vm5 = vmand %vm3158_vm8, %vm3165_vm1 }
 0x16d   : > { %1390 = vmatpush.msk.msra.mxu1 %vm3941_vm4, %v3745_v2  ;;  %vm3952_vm4 = vnez %v3847_v44 }
 0x16e   : > { %vm3953_vm12 = vmand %vm3951_vm2, %vm3952_vm4  ;;  %vm3962_vm2 = vnez %v3886_v54 }
 0x16f   : > { %1391 = vmatpush.msk.msra.mxu1 %vm3944_vm11, %v3745_v2  ;;  %vm3955_vm11 = vnez %v3856_v15  ;;  %vm3963_vm4 = vmand %vm3196_vm6, %vm3962_vm2 }
 0x170   : > { %vm3956_vm15 = vmand %vm3954_vm9, %vm3955_vm11 }
 0x171   : > { %1392 = vmatpush.msk.msra.mxu1 %vm3947_vm0, %v3745_v2  ;;  %vm3958_vm0 = vnez %v3865_v21 }
 0x172   : > { %vm3959_vm14 = vmand %vm3957_vm3, %vm3958_vm0 }
 0x173   : > { %1393 = vmatpush.msk.msra.mxu1 %vm3950_vm10, %v3745_v2  ;;  %vm3961_vm10 = vmand %vm3170_vm7, %vm3175_vm13 }
 0x175   : > { %1394 = vmatpush.msk.msra.mxu1 %vm3953_vm12, %v3745_v2 }
 0x177   : > { %1395 = vmatpush.msk.msra.mxu1 %vm3956_vm15, %v3745_v2  ;;  %vm3969_vm15 = vcmask 1043456  }
 0x179   : > { %1396 = vmatpush.msk.msra.mxu1 %vm3959_vm14, %v3745_v2 }
 0x17b   : > { %1397 = vmatpush.msk.msra.mxu1 %vm3960_vm5, %v3745_v2 }
 0x17d   : > { %1398 = vmatpush.msk.msra.mxu1 %vm3961_vm10, %v3745_v2 }
 0x17f   : > { %1399 = vmatpush.msk.msra.mxu1 %vm3963_vm4, %v3745_v2 }
 0x1d1   : > { %v984_v23 = vpop.f32.mrf.mxu0 }
 0x1d2   : > { %v1007_v27 = vsub.f32 %v3964_v52, %v984_v23  ;;  %v3967_v23 = vld [vmem:[#allocation18_spill] sm:$0xff] }
 0x1d4   : > { %v1009_v14 = vmul.f32 1.442695, %v1007_v27 }
 0x1d6   : > { %1485 = vpow2.f32 %v1009_v14 }
 0x1dc   : > { %v3385_v49 = vpop.eup %1485 }
 0x1dd   : > { %v462_v26 = vpop.f32.mrf.mxu1  ;;  %1029 = vmatmul.f32.vlgmr.msrb.gmra.mxu2 %v3385_v49  ;;  %v1095_v51 = vmul.f32 85.333336, %v3385_v49 }
 0x1de   : > { %v463_v1 = vadd.f32 %v462_v26, %v436_v34 }
 0x1e0   : > { %v465_v60 = vmul.f32 0.5, %v463_v1 }
 0x1e2   : > { %1487 = vtanh.f32 %v465_v60 }
 0x1e5   : > { %v1004_v2 = vpop.f32.mrf.mxu1 }
 0x1e6   : > { %v1008_v29 = vsub.f32 %v3965_v30, %v1004_v2 }
 0x1e8   : > { %v1488_v8 = vpop.eup %1487  ;;  %v1011_v6 = vmul.f32 1.442695, %v1008_v29 }
 0x1e9   : > { %v489_v35 = vmul.f32 %v1488_v8, %v488_v13  ;;  %v469_v19 = vmul.f32 %v1488_v8, %v468_v3  ;;  %v529_v63 = vmul.f32 %v1488_v8, %v528_v57  ;;  %v509_v44 = vmul.f32 %v1488_v8, %v508_v59  ;;  %v3968_v13 = vld [vmem:[#allocation16_spill] sm:$0xff] }
 0x1ea   : > { %1489 = vpow2.f32 %v1011_v6 }
 0x1eb   : > { %v492_v33 = vadd.f32 %v491_v38, %v489_v35  ;;  %v472_v5 = vadd.f32 %v471_v18, %v469_v19  ;;  %v532_v4 = vadd.f32 %v531_v50, %v529_v63  ;;  %v512_v15 = vadd.f32 %v511_v53, %v509_v44 }
 0x1ed   : > { %v493_v41 = vperm.slane %v492_v33, 0  ;;  %v473_v56 = vperm.slane %v472_v5, 0  ;;  %v533_v55 = vperm.slane %v532_v4, 0  ;;  %v513_v47 = vperm.slane %v512_v15, 0 }
 0x1ef   : > { %498 = vperm.xlu2 %1481, %v493_v41   ;;  %478 = vperm.xlu1 %1479, %v473_v56  }
 0x1f0   : > { %v1490_v43 = vpop.eup %1489 }
 0x1f1   : > { %1049 = vmatmul.f32.vlgmr.msrb.gmra.mxu3 %v1490_v43  ;;  %v1096_v34 = vmul.f32 85.333336, %v1490_v43 }
 0x1f7   : > { %1482 = vset.pattern.permute.xlu2 %v536_v46  ;;  %1480 = vset.pattern.permute.xlu1 %v516_v16 }
 0x1ff   : > { %538 = vperm.xlu2 %1482, %v533_v55   ;;  %518 = vperm.xlu1 %1480, %v513_v47  }
 0x249   : > { %v499_v12 = vpop.permute.xlu2 %498 }
 0x24a   : > { %v504_v33 = vperm.slane %v499_v12, %v3967_v23 }
 0x259   : > { %v539_v49 = vpop.permute.xlu2 %538 }
 0x25a   : > { %v544_v38 = vperm.slane %v539_v49, %v3967_v23 }
 0x260   : > { %v1030_v61 = vpop.f32.mrf.mxu2 }
 0x261   : > { %v479_v62 = vpop.permute.xlu1 %478 }
 0x262   : > { %v484_v60 = vperm.slane %v479_v62, %v3967_v23 }
 0x264   : > { %v486_v18 = vmul.f32 %v484_v60, %v3968_v13 }
 0x266   : > { %v506_v56 = vadd.f32 %v504_v33, %v486_v18 }
 0x271   : > { %v519_v37 = vpop.permute.xlu1 %518 }
 0x272   : > { %v524_v52 = vperm.slane %v519_v37, %v3967_v23 }
 0x274   : > { %v1050_v21 = vpop.f32.mrf.mxu3  ;;  %v526_v3 = vmul.f32 %v524_v52, %v3968_v13 }
 0x275   : > { %v1051_v58 = vadd.f32 %v1050_v21, %v1030_v61 }
 0x276   : > { %v546_v5 = vadd.f32 %v544_v38, %v526_v3 }
 0x277   : > { %1069 = vmatmul.f32.vlgmr.msra.gmra.mxu0 %v1051_v58  ;;  %1089 = vmatmul.f32.vlgmr.msra.gmra.mxu1 %v1051_v58 }
 0x278   : > { %v547_v59 = vmax.f32 %v506_v56, %v546_v5 }
 0x2f4   : > { %v1070_v39 = vpop.f32.mrf.mxu0  ;;  %v1090_v25 = vpop.f32.mrf.mxu1 }
 0x2f5   : > { %v1093_v24 = vmax.f32 %v1070_v39, 1e-30  ;;  %v1094_v40 = vmax.f32 %v1090_v25, 1e-30 }
 0x2f7   : > { %1491 = vrcp.f32 %v1093_v24  ;;  %v1108_v45 = vand.u32 2147483648, %v1093_v24  ;;  %v1106_v31 = vand.u32 2147483647, %v1093_v24  ;;  %v1122_v36 = vand.u32 2147483648, %v1094_v40 }
 0x2f8   : > { %1493 = vrcp.f32 %v1094_v40  ;;  %v1120_v7 = vand.u32 2147483647, %v1094_v40  ;;  %vm1102_vm1 = vweird.f32 %v1093_v24  ;;  %vm1116_vm13 = vweird.f32 %v1094_v40 }
 0x2f9   : > { %v1109_v48 = vor.u32 1.1754944e-38, %v1108_v45  ;;  %vm1107_vm12 = vcmp.eq.f32.partialorder %v1106_v31, 8.507059e+37  ;;  %v1123_v14 = vor.u32 1.1754944e-38, %v1122_v36 }
 0x2fa   : > { %vm1121_vm11 = vcmp.eq.f32.partialorder %v1120_v7, 8.507059e+37 }
 0x2fd   : > { %v1492_v0 = vpop.eup %1491 }
 0x2fe   : > { %v1494_v54 = vpop.eup %1493  ;;  %v1098_v9 = vmul.f32 %v1492_v0, %v1093_v24  ;;  %vm1103_vm6 = vweird.f32 %v1492_v0 }
 0x2ff   : > { %v1112_v32 = vmul.f32 %v1494_v54, %v1094_v40  ;;  %vm1117_vm8 = vweird.f32 %v1494_v54  ;;  %vm1104_vm7 = vmor %vm1102_vm1, %vm1103_vm6 }
 0x300   : > { %v1099_v10 = vsub.f32 1.0, %v1098_v9  ;;  %vm1118_vm9 = vmor %vm1116_vm13, %vm1117_vm8 }
 0x301   : > { %v1113_v17 = vsub.f32 1.0, %v1112_v32 }
 0x302   : > { %v1100_v22 = vmul.f32 %v1492_v0, %v1099_v10 }
 0x303   : > { %v1114_v28 = vmul.f32 %v1494_v54, %v1113_v17 }
 0x304   : > { %v1101_v42 = vadd.f32 %v1492_v0, %v1100_v22 }
 0x305   : > { %v1115_v20 = vadd.f32 %v1494_v54, %v1114_v28 }
 0x306   : > { %v1105_v27 = vsel %vm1104_vm7, %v1492_v0, %v1101_v42 }
 0x307   : > { %v1119_v26 = vsel %vm1118_vm9, %v1494_v54, %v1115_v20  ;;  %v1110_v1 = vsel %vm1107_vm12, %v1109_v48, %v1105_v27 }
 0x308   : > { %v1124_v2 = vsel %vm1121_vm11, %v1123_v14, %v1119_v26  ;;  %v1125_v30 = vmul.f32 %v1110_v1, %v1095_v51 }
 0x309   : > { %v1126_v29 = vmul.f32 %v1124_v2, %v1096_v34 }
 0x30a   : > { %v1127_v8 = vmax.f32 %v1125_v30, 0.0 }
 0x30b   : > { %v1128_v6 = vmax.f32 %v1126_v29, 0.0 }
 0x30c   : > { %v1129_v35 = vmin.f32 %v1127_v8, 1.0 }
 0x30d   : > { %v1130_v19 = vmin.f32 %v1128_v6, 1.0 }
 0x30e   : > { %v1131_v43 = vperm.slane %v1129_v35, 0 }
 0x30f   : > { %v1132_v41 = vperm.slane %v1130_v19, 0 }
 0x311   : > { %v1135_v57 = vrot.slane %v1132_v41, 4 }
 0x313   : > { %v1136_v11 = vsel %vm3969_vm15, %v1131_v43, %v1135_v57 }
 0x314   : > { %v1138_v46 = vmul.f32 %v1136_v11, %v547_v59 }
 0x316   : > { %1139 = vst [vmem:[%s380_s2] sm:$0xff] %v1138_v46 }
 0x317   : > { %1582 = shalt.err (!%p1579_p11)
}
 0x318   : > { %1417 = dma.vmem_to_hbm [thread:$0]  (%p1762_p5), %s1155_s20, 128, %s1157_s21, %s1141_s23  }
 0x319 PF: > { %s1168_s12 = sand.u32 1, %s1617_s13   ;;  %p3970_p12 = scmp.ge.s32.totalorder %s1629_s16, 2 }
 0x31a   : > { %s1169_s28 = scalar_lea.sflag [#allocation6], %s1168_s12 }
 0x31b   : > { %p1431_p13 = pnand %p3970_p12, %p1728_p6 }
 0x31d   : > { %p1432_p0 = pneg %p1431_p13 }
 0x31f   : > { %1612 = dma.done.wait (%p1432_p0), %s1169_s28, 128  }
 0x320   : > { %1614 = vsyncadd (%p1432_p0), %s1169_s28, 4294967168  ;;  %p27_p3 = scmp.ge.s32.totalorder %s1749_s26, 4   ;;  %s3971_s13 = smov %s1621_s14 }
 0x321   : > { %s3972_s14 = smov %s1625_s15  ;;  %s3973_s15 = smov %s1758_s10 }
 0x322   : > { %s3974_s16 = smov %s1749_s26  ;;  %29 = sbr.rel (!%p27_p3) target bundleno = 10 (0xa), region = 110 }
 0x327   :  { %1175 = vsyncpa [#allocation5], 1 }
 0x328   :  { %1177 = vsyncpa [#allocation5 + $0x1], 1 }
 0x329   :  { %1178 = vsyncpa [#allocation6], 1 }
 0x32a   :  { %1180 = vsyncpa [#allocation6 + $0x1], 1 }
 0x32b   :  { %1181 = vsyncpa [#allocation7], 1 }
 0x32c   :  { %1183 = vsyncpa [#allocation7 + $0x1], 1 }
 0x32d   :  { %1184 = vsyncpa [#allocation10], 1 }

</bundles_post_ra>
